<compile_context>
chip_gen: v7x
topology: tpu7x:2x2x1
jax: 0.10.0
libtpu: 0.0.40
codegen_flags: <defaults>
</compile_context>

<pallas_src>
import functools

import jax
import jax.numpy as jnp
from jax.experimental import pallas as pl
from jax.experimental.pallas import tpu as pltpu

EXPANSION = 4
_VMEM_LIMIT = 32 * 1024 * 1024  # blocks are a few MiB; safe on v5e/v6e/v7x


def _round_up(x, m):
    return (x + m - 1) // m * m


def _band_rows(Ho, Wo, target=256, cap=512):
    """Pick a divisor `th` of Ho so the band matmul M-dim (th*Wo) is MXU-sized."""
    best = 1
    for d in range(1, Ho + 1):
        if Ho % d:
            continue
        if d * Wo <= cap:
            best = d
        if d * Wo >= target:
            break
    return best


# ---------------------------------------------------------------------------
# Kernel 1: conv1 (1x1) + folded-BN + ReLU as a GEMM with VMEM-resident weights
# ---------------------------------------------------------------------------
def _conv1_kernel(a_ref, w_ref, s_ref, b_ref, o_ref):
    acc = jnp.dot(a_ref[...], w_ref[...], preferred_element_type=jnp.float32)
    o_ref[...] = jnp.maximum(acc * s_ref[...] + b_ref[...], 0.0).astype(o_ref.dtype)


def conv1x1_bn_relu(a, w, scale, bias, *, out_dtype=jnp.bfloat16, tm=512):
    """relu((a @ w) * scale + bias).  a:(M,Kp) bf16, w:(Kp,N) bf16 (padded)."""
    M, Kp = a.shape
    N = w.shape[1]
    tm = min(tm, _round_up(M, 16))           # bf16 packs 16 rows / sublane group
    grid = (pl.cdiv(M, tm),)
    return pl.pallas_call(
        _conv1_kernel,
        out_shape=jax.ShapeDtypeStruct((M, N), out_dtype),
        grid=grid,
        in_specs=[
            pl.BlockSpec((tm, Kp), lambda i: (i, 0)),
            pl.BlockSpec((Kp, N), lambda i: (0, 0)),   # weight resident in VMEM
            pl.BlockSpec((1, N), lambda i: (0, 0)),
            pl.BlockSpec((1, N), lambda i: (0, 0)),
        ],
        out_specs=pl.BlockSpec((tm, N), lambda i: (i, 0)),
        compiler_params=pltpu.CompilerParams(
            dimension_semantics=("parallel",),
            vmem_limit_bytes=_VMEM_LIMIT),
        cost_estimate=pl.CostEstimate(
            flops=2 * M * Kp * N,
            transcendentals=0,
            bytes_accessed=(M * Kp + Kp * N + M * N) * 2),
    )(a, w, scale, bias)


# ---------------------------------------------------------------------------
# Kernel 2: direct 3x3 conv (pad=1, stride) + folded-BN + ReLU, row-banded.
#   stride==1 : single padded plane, contiguous tap slices.
#   stride>1  : stride*stride polyphase planes; tap (dh,dw) lives in phase
#               (dh%stride, dw%stride) at contiguous offsets (dh//s, dw//s).
# ---------------------------------------------------------------------------
def _conv2_kernel(*args, th, Wo, stride, relu=True):
    nph = stride * stride
    xrefs = args[:nph]
    w_ref, s_ref, b_ref, o_ref = args[nph:]
    hb = pl.program_id(1)
    Cp = xrefs[0].shape[-1]
    Co = o_ref.shape[-1]
    row0 = hb * th
    acc = jnp.zeros((th * Wo, Co), jnp.float32)
    for dh in range(3):
        for dw in range(3):
            xr = xrefs[(dh % stride) * stride + (dw % stride)]
            a = xr[0, pl.ds(row0 + dh // stride, th), pl.ds(dw // stride, Wo), :]
            acc = acc + jnp.dot(a.reshape(th * Wo, Cp), w_ref[dh * 3 + dw],
                                preferred_element_type=jnp.float32)
    out = acc * s_ref[...] + b_ref[...]
    if relu:
        out = jnp.maximum(out, 0.0)
    o_ref[...] = out.reshape(1, th, Wo, Co).astype(o_ref.dtype)


def conv3x3_bn_relu(o1, w9, scale, bias, stride, *, out_dtype=jnp.bfloat16):
    Nb, H, W, Cp = o1.shape
    Co = w9.shape[-1]
    Ho = (H - 1) // stride + 1
    Wo = (W - 1) // stride + 1
    o1p = jnp.pad(o1, ((0, 0), (1, 1), (1, 1), (0, 0)))
    if stride == 1:
        phases = [o1p]
    else:
        phases = [o1p[:, p::stride, q::stride, :]
                  for p in range(stride) for q in range(stride)]
    th = _band_rows(Ho, Wo)
    n_hb = Ho // th
    in_specs = ([pl.BlockSpec((1,) + tuple(ph.shape[1:]),
                              lambda n, hb: (n, 0, 0, 0)) for ph in phases] +
                [pl.BlockSpec(tuple(w9.shape), lambda n, hb: (0, 0, 0)),
                 pl.BlockSpec((1, Co), lambda n, hb: (0, 0)),
                 pl.BlockSpec((1, Co), lambda n, hb: (0, 0))])
    phase_bytes = sum(int(p.size) for p in phases)
    return pl.pallas_call(
        functools.partial(_conv2_kernel, th=th, Wo=Wo, stride=stride),
        out_shape=jax.ShapeDtypeStruct((Nb, Ho, Wo, Co), out_dtype),
        grid=(Nb, n_hb),
        in_specs=in_specs,
        out_specs=pl.BlockSpec((1, th, Wo, Co), lambda n, hb: (n, hb, 0, 0)),
        compiler_params=pltpu.CompilerParams(
            dimension_semantics=("parallel", "parallel"),
            vmem_limit_bytes=_VMEM_LIMIT),
        cost_estimate=pl.CostEstimate(
            flops=2 * Nb * Ho * Wo * 9 * Cp * Co,
            transcendentals=0,
            bytes_accessed=(phase_bytes + int(w9.size)
                            + Nb * Ho * Wo * Co) * 2),
    )(*phases, w9, scale, bias)


# ---------------------------------------------------------------------------
# Kernel 3: conv3 (1x1 expand) + BN3 + shortcut (+BN) + residual add + ReLU,
#           fully fused, NHWC row-banded, weights VMEM-resident, bf16 output.
# ---------------------------------------------------------------------------
def _conv3_proj_kernel(a_ref, w_ref, s_ref, b_ref,
                       x_ref, ws_ref, ss_ref, bs_ref, o_ref):
    th, Wo, Co = o_ref.shape[1], o_ref.shape[2], o_ref.shape[3]
    a = a_ref[...].reshape(th * Wo, a_ref.shape[-1])
    out = jnp.dot(a, w_ref[...], preferred_element_type=jnp.float32)
    out = out * s_ref[...] + b_ref[...]
    xs = x_ref[...].reshape(th * Wo, x_ref.shape[-1])
    sc = jnp.dot(xs, ws_ref[...], preferred_element_type=jnp.float32)
    out = out + (sc * ss_ref[...] + bs_ref[...])
    o_ref[...] = jnp.maximum(out, 0.0).reshape(1, th, Wo, Co).astype(o_ref.dtype)


def _conv3_ident_kernel(a_ref, w_ref, s_ref, b_ref, r_ref, o_ref):
    th, Wo, Co = o_ref.shape[1], o_ref.shape[2], o_ref.shape[3]
    a = a_ref[...].reshape(th * Wo, a_ref.shape[-1])
    out = jnp.dot(a, w_ref[...], preferred_element_type=jnp.float32)
    out = out * s_ref[...] + b_ref[...]
    out = out + r_ref[...].reshape(th * Wo, Co).astype(jnp.float32)  # f32 add
    o_ref[...] = jnp.maximum(out, 0.0).reshape(1, th, Wo, Co).astype(o_ref.dtype)


def conv3_fused(o2, w3, s3, b3, xsc, ws=None, ss=None, bs=None,
                *, out_dtype=jnp.bfloat16):
    Nb, Ho, Wo, Pp = o2.shape
    Np = w3.shape[-1]
    th = _band_rows(Ho, Wo)
    n_hb = Ho // th
    o2_spec = pl.BlockSpec((1, th, Wo, Pp), lambda n, hb: (n, hb, 0, 0))
    w3_spec = pl.BlockSpec((Pp, Np), lambda n, hb: (0, 0))
    sb_spec = pl.BlockSpec((1, Np), lambda n, hb: (0, 0))
    common = dict(
        out_shape=jax.ShapeDtypeStruct((Nb, Ho, Wo, Np), out_dtype),
        grid=(Nb, n_hb),
        out_specs=pl.BlockSpec((1, th, Wo, Np), lambda n, hb: (n, hb, 0, 0)),
        compiler_params=pltpu.CompilerParams(
            dimension_semantics=("parallel", "parallel"),
            vmem_limit_bytes=_VMEM_LIMIT),
    )
    if ws is not None:  # projection shortcut (stride and/or channel change)
        Cin_p = xsc.shape[-1]
        x_spec = pl.BlockSpec((1, th, Wo, Cin_p), lambda n, hb: (n, hb, 0, 0))
        ws_spec = pl.BlockSpec((Cin_p, Np), lambda n, hb: (0, 0))
        return pl.pallas_call(
            _conv3_proj_kernel,
            in_specs=[o2_spec, w3_spec, sb_spec, sb_spec,
                      x_spec, ws_spec, sb_spec, sb_spec],
            cost_estimate=pl.CostEstimate(
                flops=2 * Nb * Ho * Wo * (Pp + Cin_p) * Np,
                transcendentals=0,
                bytes_accessed=(int(o2.size) + int(xsc.size) + int(w3.size)
                                + int(ws.size) + Nb * Ho * Wo * Np) * 2),
            **common)(o2, w3, s3, b3, xsc, ws, ss, bs)
    else:               # identity shortcut
        r_spec = pl.BlockSpec((1, th, Wo, Np), lambda n, hb: (n, hb, 0, 0))
        return pl.pallas_call(
            _conv3_ident_kernel,
            in_specs=[o2_spec, w3_spec, sb_spec, sb_spec, r_spec],
            cost_estimate=pl.CostEstimate(
                flops=2 * Nb * Ho * Wo * Pp * Np,
                transcendentals=0,
                bytes_accessed=(int(o2.size) + int(xsc.size) + int(w3.size)
                                + Nb * Ho * Wo * Np) * 2),
            **common)(o2, w3, s3, b3, xsc)


# ---------------------------------------------------------------------------
# Deterministic parameters (normalization='bn', eval semantics, folded affine)
# ---------------------------------------------------------------------------
def init_params(key, in_planes, planes, stride):
    ks = jax.random.split(key, 8)
    P = planes
    Cout = EXPANSION * planes
    Cin_p = _round_up(in_planes, 128)
    Pp = _round_up(P, 128)
    Np = _round_up(Cout, 128)

    def conv_w(k, shape):  # PyTorch layout (out, in, kh, kw)
        fan_in = shape[1] * shape[2] * shape[3]
        return jax.random.normal(k, shape, jnp.float32) * (2.0 / fan_in) ** 0.5

    def bn_fold(k, c):
        k1, k2, k3, k4 = jax.random.split(k, 4)
        gamma = jax.random.uniform(k1, (c,), minval=0.5, maxval=1.5)
        beta = jax.random.normal(k2, (c,)) * 0.1
        mean = jax.random.normal(k3, (c,)) * 0.1
        var = jax.random.uniform(k4, (c,), minval=0.5, maxval=1.5)
        scale = gamma / jnp.sqrt(var + 1e-5)
        return scale, beta - mean * scale

    def pad2(a, rows, cols):
        return jnp.pad(a, ((0, rows - a.shape[0]), (0, cols - a.shape[1])))

    def padrow(v, n):
        return jnp.pad(v.reshape(1, -1),
                       ((0, 0), (0, n - v.shape[0]))).astype(jnp.float32)

    w1 = conv_w(ks[0], (P, in_planes, 1, 1))
    w2 = conv_w(ks[1], (P, P, 3, 3))
    w3 = conv_w(ks[2], (Cout, P, 1, 1))
    s1, b1 = bn_fold(ks[3], P)
    s2, b2 = bn_fold(ks[4], P)
    s3, b3 = bn_fold(ks[5], Cout)

    params = dict(
        # kernel-side (channel-padded, bf16 MXU operands; taps ordered kh*3+kw)
        w1k=pad2(jnp.transpose(w1[:, :, 0, 0], (1, 0)), Cin_p, Pp).astype(jnp.bfloat16),
        w2k=jnp.pad(jnp.transpose(w2, (2, 3, 1, 0)).reshape(9, P, P),
                    ((0, 0), (0, Pp - P), (0, Pp - P))).astype(jnp.bfloat16),
        w3k=pad2(jnp.transpose(w3[:, :, 0, 0], (1, 0)), Pp, Np).astype(jnp.bfloat16),
        s1k=padrow(s1, Pp), b1k=padrow(b1, Pp),
        s2k=padrow(s2, Pp), b2k=padrow(b2, Pp),
        s3k=padrow(s3, Np), b3k=padrow(b3, Np),
        # reference-side (f32, PyTorch layouts)
        w1_pt=w1, w2_pt=w2, w3_pt=w3,
        s1=s1, b1=b1, s2=s2, b2=b2, s3=s3, b3=b3,
    )
    if stride != 1 or in_planes != Cout:
        ws = conv_w(ks[6], (Cout, in_planes, 1, 1))
        ss, bs = bn_fold(ks[7], Cout)
        params.update(
            wsk=pad2(jnp.transpose(ws[:, :, 0, 0], (1, 0)), Cin_p, Np).astype(jnp.bfloat16),
            ssk=padrow(ss, Np), bsk=padrow(bs, Np),
            ws_pt=ws, ss=ss, bs=bs)
    return params


# ---------------------------------------------------------------------------
# Bottleneck forward (fake_relu=False path; FakeReLU forward == ReLU anyway)
# ---------------------------------------------------------------------------
def bottleneck_forward(x_nchw, params, in_planes, planes, stride):
    Cout = EXPANSION * planes
    Cin_p = params["w1k"].shape[0]
    Pp = params["w1k"].shape[1]
    Nb, Cin, H, W = x_nchw.shape

    # NCHW -> NHWC, bf16, channel pad (one fused XLA pass, reused by shortcut)
    xb = jnp.transpose(x_nchw, (0, 2, 3, 1)).astype(jnp.bfloat16)
    xb = jnp.pad(xb, ((0, 0), (0, 0), (0, 0), (0, Cin_p - Cin)))

    # conv1 (1x1) + bn1 + relu
    o1 = conv1x1_bn_relu(xb.reshape(-1, Cin_p),
                         params["w1k"], params["s1k"], params["b1k"])
    o1 = o1.reshape(Nb, H, W, Pp)

    # conv2 (3x3, stride, pad=1) + bn2 + relu — row-banded direct conv
    o2 = conv3x3_bn_relu(o1, params["w2k"], params["s2k"], params["b2k"], stride)
    Ho, Wo = o2.shape[1], o2.shape[2]

    # conv3 (1x1 expand) + bn3 + shortcut + add + relu — one fused kernel
    if stride != 1 or in_planes != Cout:
        x_ds = xb[:, ::stride, ::stride, :][:, :Ho, :Wo, :]
        out = conv3_fused(o2, params["w3k"], params["s3k"], params["b3k"],
                          x_ds, params["wsk"], params["ssk"], params["bsk"])
    else:
        out = conv3_fused(o2, params["w3k"], params["s3k"], params["b3k"], xb)

    out = out[..., :Cout]                                   # drop channel pad
    return jnp.transpose(out, (0, 3, 1, 2)).astype(jnp.float32)  # NHWC->NCHW


# ---------------------------------------------------------------------------
# Pure-JAX f32 reference (lax.conv, NCHW) — correctness check only
# ---------------------------------------------------------------------------
def reference_forward(x, params, in_planes, planes, stride):
    def conv(v, w, stride=1, pad=0):
        return jax.lax.conv_general_dilated(
            v, w, window_strides=(stride, stride),
            padding=[(pad, pad), (pad, pad)],
            dimension_numbers=("NCHW", "OIHW", "NCHW"))

    def bn(v, s, b):
        return v * s[None, :, None, None] + b[None, :, None, None]

    relu = lambda v: jnp.maximum(v, 0.0)
    out = relu(bn(conv(x, params["w1_pt"]), params["s1"], params["b1"]))
    out = relu(bn(conv(out, params["w2_pt"], stride=stride, pad=1),
                  params["s2"], params["b2"]))
    out = bn(conv(out, params["w3_pt"]), params["s3"], params["b3"])
    if stride != 1 or in_planes != EXPANSION * planes:
        sc = bn(conv(x, params["ws_pt"], stride=stride), params["ss"], params["bs"])
    else:
        sc = x
    return relu(out + sc)


if __name__ == "__main__":
    # TODO(synk): only normalization='bn' (eval) + activation='relu' are
    # implemented; gn/ln/in and selu/sigmoid/tanh/leaky_relu are not.
    in_planes, planes, stride = 16, 8, 2
    key = jax.random.PRNGKey(0)
    kx, kp = jax.random.split(key)
    x = jax.random.normal(kx, (2, in_planes, 16, 16), jnp.float32)  # NCHW
    params = init_params(kp, in_planes, planes, stride)

    fwd = jax.jit(lambda xx, pp: bottleneck_forward(xx, pp, in_planes, planes, stride))
    out = jax.block_until_ready(fwd(x, params))

    ref = reference_forward(x, params, in_planes, planes, stride)
    assert out.shape == (2, EXPANSION * planes, 8, 8), out.shape
    # bf16 operands / bf16 intermediates, f32 MXU accumulation vs f32 reference.
    assert jnp.allclose(out, ref, atol=0.2, rtol=0.1), \
        float(jnp.max(jnp.abs(out - ref)))
    print("KERNEL_OK")
</pallas_src>

<mosaic_0001>
module attributes {stable_mosaic.version = 11 : i64} {
  func.func @_conv1_kernel(%arg0: i32, %arg1: memref<512x128xbf16, #tpu.memory_space<vmem>>, %arg2: memref<128x128xbf16, #tpu.memory_space<vmem>>, %arg3: memref<1x128xf32, #tpu.memory_space<vmem>>, %arg4: memref<1x128xf32, #tpu.memory_space<vmem>>, %arg5: memref<512x128xbf16, #tpu.memory_space<vmem>>) attributes {dimension_semantics = [#tpu.dimension_semantics<parallel>], iteration_bounds = array<i64: 1>, scalar_prefetch = 0 : i64, scratch_operands = 0 : i64, tpu.core_type = #tpu.core_type<tc>, window_params = [{transform_indices = @transform_0, window_bounds = array<i64: 512, 128>}, {pipeline_mode = #tpu.pipeline_mode<synchronous>, transform_indices = @transform_1, window_bounds = array<i64: 128, 128>}, {pipeline_mode = #tpu.pipeline_mode<synchronous>, transform_indices = @transform_2, window_bounds = array<i64: 1, 128>}, {pipeline_mode = #tpu.pipeline_mode<synchronous>, transform_indices = @transform_3, window_bounds = array<i64: 1, 128>}, {transform_indices = @transform_4, window_bounds = array<i64: 512, 128>}]} {
    %c0 = arith.constant 0 : index
    %c0_0 = arith.constant 0 : index
    %0 = vector.load %arg1[%c0, %c0_0] : memref<512x128xbf16, #tpu.memory_space<vmem>>, vector<512x128xbf16>
    %c0_1 = arith.constant 0 : index
    %c0_2 = arith.constant 0 : index
    %1 = vector.load %arg2[%c0_1, %c0_2] : memref<128x128xbf16, #tpu.memory_space<vmem>>, vector<128x128xbf16>
    %cst = arith.constant dense<0.000000e+00> : vector<512x128xf32>
    %2 = tpu.matmul %0, %1, %cst {dimension_numbers = #tpu.dot_dimension_numbers<[1], [0], [0], [1], [0, 0, 1, 1], [], []>} : vector<512x128xbf16>, vector<128x128xbf16>, vector<512x128xf32> -> vector<512x128xf32>
    %c0_3 = arith.constant 0 : index
    %c0_4 = arith.constant 0 : index
    %3 = vector.load %arg3[%c0_3, %c0_4] : memref<1x128xf32, #tpu.memory_space<vmem>>, vector<1x128xf32>
    %4 = vector.broadcast %3 : vector<1x128xf32> to vector<512x128xf32>
    %5 = arith.mulf %2, %4 : vector<512x128xf32>
    %c0_5 = arith.constant 0 : index
    %c0_6 = arith.constant 0 : index
    %6 = vector.load %arg4[%c0_5, %c0_6] : memref<1x128xf32, #tpu.memory_space<vmem>>, vector<1x128xf32>
    %7 = vector.broadcast %6 : vector<1x128xf32> to vector<512x128xf32>
    %8 = arith.addf %5, %7 : vector<512x128xf32>
    %cst_7 = arith.constant 0.000000e+00 : f32
    %9 = vector.broadcast %cst_7 : f32 to vector<512x128xf32>
    %10 = arith.maximumf %8, %9 : vector<512x128xf32>
    %11 = arith.truncf %10 : vector<512x128xf32> to vector<512x128xbf16>
    %c0_8 = arith.constant 0 : index
    %c0_9 = arith.constant 0 : index
    %12 = vector.load %arg5[%c0_8, %c0_9] : memref<512x128xbf16, #tpu.memory_space<vmem>>, vector<512x128xbf16>
    tpu.vector_store %arg5[%c0_8, %c0_9], %11 {strides = array<i32>} : memref<512x128xbf16, #tpu.memory_space<vmem>>, vector<512x128xbf16>,
    return
  }
  func.func @transform_0(%arg0: i32) -> (i32, i32) {
    %c0_i32 = arith.constant 0 : i32
    %c0_i32_0 = arith.constant 0 : i32
    return %arg0, %c0_i32 : i32, i32
  }
  func.func @transform_1(%arg0: i32) -> (i32, i32) {
    %c0_i32 = arith.constant 0 : i32
    %c0_i32_0 = arith.constant 0 : i32
    %c0_i32_1 = arith.constant 0 : i32
    return %c0_i32, %c0_i32_0 : i32, i32
  }
  func.func @transform_2(%arg0: i32) -> (i32, i32) {
    %c0_i32 = arith.constant 0 : i32
    %c0_i32_0 = arith.constant 0 : i32
    %c0_i32_1 = arith.constant 0 : i32
    return %c0_i32, %c0_i32_0 : i32, i32
  }
  func.func @transform_3(%arg0: i32) -> (i32, i32) {
    %c0_i32 = arith.constant 0 : i32
    %c0_i32_0 = arith.constant 0 : i32
    %c0_i32_1 = arith.constant 0 : i32
    return %c0_i32, %c0_i32_0 : i32, i32
  }
  func.func @transform_4(%arg0: i32) -> (i32, i32) {
    %c0_i32 = arith.constant 0 : i32
    %c0_i32_0 = arith.constant 0 : i32
    return %arg0, %c0_i32 : i32, i32
  }
}

module attributes {stable_mosaic.version = 11 : i64} {
  func.func @_conv3_proj_kernel(%arg0: i32, %arg1: i32, %arg2: memref<1x8x8x128xbf16, #tpu.memory_space<vmem>>, %arg3: memref<128x128xbf16, #tpu.memory_space<vmem>>, %arg4: memref<1x128xf32, #tpu.memory_space<vmem>>, %arg5: memref<1x128xf32, #tpu.memory_space<vmem>>, %arg6: memref<1x8x8x128xbf16, #tpu.memory_space<vmem>>, %arg7: memref<128x128xbf16, #tpu.memory_space<vmem>>, %arg8: memref<1x128xf32, #tpu.memory_space<vmem>>, %arg9: memref<1x128xf32, #tpu.memory_space<vmem>>, %arg10: memref<1x8x8x128xbf16, #tpu.memory_space<vmem>>) attributes {dimension_semantics = [#tpu.dimension_semantics<parallel>, #tpu.dimension_semantics<parallel>], iteration_bounds = array<i64: 2, 1>, scalar_prefetch = 0 : i64, scratch_operands = 0 : i64, tpu.core_type = #tpu.core_type<tc>, window_params = [{transform_indices = @transform_0, window_bounds = array<i64: 1, 8, 8, 128>}, {pipeline_mode = #tpu.pipeline_mode<synchronous>, transform_indices = @transform_1, window_bounds = array<i64: 128, 128>}, {pipeline_mode = #tpu.pipeline_mode<synchronous>, transform_indices = @transform_2, window_bounds = array<i64: 1, 128>}, {pipeline_mode = #tpu.pipeline_mode<synchronous>, transform_indices = @transform_3, window_bounds = array<i64: 1, 128>}, {transform_indices = @transform_4, window_bounds = array<i64: 1, 8, 8, 128>}, {pipeline_mode = #tpu.pipeline_mode<synchronous>, transform_indices = @transform_5, window_bounds = array<i64: 128, 128>}, {pipeline_mode = #tpu.pipeline_mode<synchronous>, transform_indices = @transform_6, window_bounds = array<i64: 1, 128>}, {pipeline_mode = #tpu.pipeline_mode<synchronous>, transform_indices = @transform_7, window_bounds = array<i64: 1, 128>}, {transform_indices = @transform_8, window_bounds = array<i64: 1, 8, 8, 128>}]} {
    %c0 = arith.constant 0 : index
    %c0_0 = arith.constant 0 : index
    %c0_1 = arith.constant 0 : index
    %c0_2 = arith.constant 0 : index
    %0 = vector.load %arg2[%c0, %c0_0, %c0_1, %c0_2] : memref<1x8x8x128xbf16, #tpu.memory_space<vmem>>, vector<1x8x8x128xbf16>
    %1 = vector.shape_cast %0 : vector<1x8x8x128xbf16> to vector<64x128xbf16>
    %c0_3 = arith.constant 0 : index
    %c0_4 = arith.constant 0 : index
    %2 = vector.load %arg3[%c0_3, %c0_4] : memref<128x128xbf16, #tpu.memory_space<vmem>>, vector<128x128xbf16>
    %cst = arith.constant dense<0.000000e+00> : vector<64x128xf32>
    %3 = tpu.matmul %1, %2, %cst {dimension_numbers = #tpu.dot_dimension_numbers<[1], [0], [0], [1], [0, 0, 1, 1], [], []>} : vector<64x128xbf16>, vector<128x128xbf16>, vector<64x128xf32> -> vector<64x128xf32>
    %c0_5 = arith.constant 0 : index
    %c0_6 = arith.constant 0 : index
    %4 = vector.load %arg4[%c0_5, %c0_6] : memref<1x128xf32, #tpu.memory_space<vmem>>, vector<1x128xf32>
    %5 = vector.broadcast %4 : vector<1x128xf32> to vector<64x128xf32>
    %6 = arith.mulf %3, %5 : vector<64x128xf32>
    %c0_7 = arith.constant 0 : index
    %c0_8 = arith.constant 0 : index
    %7 = vector.load %arg5[%c0_7, %c0_8] : memref<1x128xf32, #tpu.memory_space<vmem>>, vector<1x128xf32>
    %8 = vector.broadcast %7 : vector<1x128xf32> to vector<64x128xf32>
    %9 = arith.addf %6, %8 : vector<64x128xf32>
    %c0_9 = arith.constant 0 : index
    %c0_10 = arith.constant 0 : index
    %c0_11 = arith.constant 0 : index
    %c0_12 = arith.constant 0 : index
    %10 = vector.load %arg6[%c0_9, %c0_10, %c0_11, %c0_12] : memref<1x8x8x128xbf16, #tpu.memory_space<vmem>>, vector<1x8x8x128xbf16>
    %11 = vector.shape_cast %10 : vector<1x8x8x128xbf16> to vector<64x128xbf16>
    %c0_13 = arith.constant 0 : index
    %c0_14 = arith.constant 0 : index
    %12 = vector.load %arg7[%c0_13, %c0_14] : memref<128x128xbf16, #tpu.memory_space<vmem>>, vector<128x128xbf16>
    %cst_15 = arith.constant dense<0.000000e+00> : vector<64x128xf32>
    %13 = tpu.matmul %11, %12, %cst_15 {dimension_numbers = #tpu.dot_dimension_numbers<[1], [0], [0], [1], [0, 0, 1, 1], [], []>} : vector<64x128xbf16>, vector<128x128xbf16>, vector<64x128xf32> -> vector<64x128xf32>
    %c0_16 = arith.constant 0 : index
    %c0_17 = arith.constant 0 : index
    %14 = vector.load %arg8[%c0_16, %c0_17] : memref<1x128xf32, #tpu.memory_space<vmem>>, vector<1x128xf32>
    %15 = vector.broadcast %14 : vector<1x128xf32> to vector<64x128xf32>
    %16 = arith.mulf %13, %15 : vector<64x128xf32>
    %c0_18 = arith.constant 0 : index
    %c0_19 = arith.constant 0 : index
    %17 = vector.load %arg9[%c0_18, %c0_19] : memref<1x128xf32, #tpu.memory_space<vmem>>, vector<1x128xf32>
    %18 = vector.broadcast %17 : vector<1x128xf32> to vector<64x128xf32>
    %19 = arith.addf %16, %18 : vector<64x128xf32>
    %20 = arith.addf %9, %19 : vector<64x128xf32>
    %cst_20 = arith.constant 0.000000e+00 : f32
    %21 = vector.broadcast %cst_20 : f32 to vector<64x128xf32>
    %22 = arith.maximumf %20, %21 : vector<64x128xf32>
    %23 = vector.shape_cast %22 : vector<64x128xf32> to vector<1x8x8x128xf32>
    %24 = arith.truncf %23 : vector<1x8x8x128xf32> to vector<1x8x8x128xbf16>
    %c0_21 = arith.constant 0 : index
    %c0_22 = arith.constant 0 : index
    %c0_23 = arith.constant 0 : index
    %c0_24 = arith.constant 0 : index
    %25 = vector.load %arg10[%c0_21, %c0_22, %c0_23, %c0_24] : memref<1x8x8x128xbf16, #tpu.memory_space<vmem>>, vector<1x8x8x128xbf16>
    tpu.vector_store %arg10[%c0_21, %c0_22, %c0_23, %c0_24], %24 {strides = array<i32>} : memref<1x8x8x128xbf16, #tpu.memory_space<vmem>>, vector<1x8x8x128xbf16>,
    return
  }
  func.func @transform_0(%arg0: i32, %arg1: i32) -> (i32, i32, i32, i32) {
    %c0_i32 = arith.constant 0 : i32
    %c0_i32_0 = arith.constant 0 : i32
    %c0_i32_1 = arith.constant 0 : i32
    return %arg0, %arg1, %c0_i32, %c0_i32_0 : i32, i32, i32, i32
  }
  func.func @transform_1(%arg0: i32, %arg1: i32) -> (i32, i32) {
    %c0_i32 = arith.constant 0 : i32
    %c0_i32_0 = arith.constant 0 : i32
    %c0_i32_1 = arith.constant 0 : i32
    return %c0_i32, %c0_i32_0 : i32, i32
  }
  func.func @transform_2(%arg0: i32, %arg1: i32) -> (i32, i32) {
    %c0_i32 = arith.constant 0 : i32
    %c0_i32_0 = arith.constant 0 : i32
    %c0_i32_1 = arith.constant 0 : i32
    return %c0_i32, %c0_i32_0 : i32, i32
  }
  func.func @transform_3(%arg0: i32, %arg1: i32) -> (i32, i32) {
    %c0_i32 = arith.constant 0 : i32
    %c0_i32_0 = arith.constant 0 : i32
    %c0_i32_1 = arith.constant 0 : i32
    return %c0_i32, %c0_i32_0 : i32, i32
  }
  func.func @transform_4(%arg0: i32, %arg1: i32) -> (i32, i32, i32, i32) {
    %c0_i32 = arith.constant 0 : i32
    %c0_i32_0 = arith.constant 0 : i32
    %c0_i32_1 = arith.constant 0 : i32
    return %arg0, %arg1, %c0_i32, %c0_i32_0 : i32, i32, i32, i32
  }
  func.func @transform_5(%arg0: i32, %arg1: i32) -> (i32, i32) {
    %c0_i32 = arith.constant 0 : i32
    %c0_i32_0 = arith.constant 0 : i32
    %c0_i32_1 = arith.constant 0 : i32
    return %c0_i32, %c0_i32_0 : i32, i32
  }
  func.func @transform_6(%arg0: i32, %arg1: i32) -> (i32, i32) {
    %c0_i32 = arith.constant 0 : i32
    %c0_i32_0 = arith.constant 0 : i32
    %c0_i32_1 = arith.constant 0 : i32
    return %c0_i32, %c0_i32_0 : i32, i32
  }
  func.func @transform_7(%arg0: i32, %arg1: i32) -> (i32, i32) {
    %c0_i32 = arith.constant 0 : i32
    %c0_i32_0 = arith.constant 0 : i32
    %c0_i32_1 = arith.constant 0 : i32
    return %c0_i32, %c0_i32_0 : i32, i32
  }
  func.func @transform_8(%arg0: i32, %arg1: i32) -> (i32, i32, i32, i32) {
    %c0_i32 = arith.constant 0 : i32
    %c0_i32_0 = arith.constant 0 : i32
    %c0_i32_1 = arith.constant 0 : i32
    return %arg0, %arg1, %c0_i32, %c0_i32_0 : i32, i32, i32, i32
  }
}

module attributes {stable_mosaic.version = 11 : i64} {
  func.func @_conv2_kernel(%arg0: i32, %arg1: i32, %arg2: memref<1x9x9x128xbf16, #tpu.memory_space<vmem>>, %arg3: memref<1x9x9x128xbf16, #tpu.memory_space<vmem>>, %arg4: memref<1x9x9x128xbf16, #tpu.memory_space<vmem>>, %arg5: memref<1x9x9x128xbf16, #tpu.memory_space<vmem>>, %arg6: memref<9x128x128xbf16, #tpu.memory_space<vmem>>, %arg7: memref<1x128xf32, #tpu.memory_space<vmem>>, %arg8: memref<1x128xf32, #tpu.memory_space<vmem>>, %arg9: memref<1x8x8x128xbf16, #tpu.memory_space<vmem>>) attributes {dimension_semantics = [#tpu.dimension_semantics<parallel>, #tpu.dimension_semantics<parallel>], iteration_bounds = array<i64: 2, 1>, scalar_prefetch = 0 : i64, scratch_operands = 0 : i64, tpu.core_type = #tpu.core_type<tc>, window_params = [{transform_indices = @transform_0, window_bounds = array<i64: 1, 9, 9, 128>}, {transform_indices = @transform_1, window_bounds = array<i64: 1, 9, 9, 128>}, {transform_indices = @transform_2, window_bounds = array<i64: 1, 9, 9, 128>}, {transform_indices = @transform_3, window_bounds = array<i64: 1, 9, 9, 128>}, {pipeline_mode = #tpu.pipeline_mode<synchronous>, transform_indices = @transform_4, window_bounds = array<i64: 9, 128, 128>}, {pipeline_mode = #tpu.pipeline_mode<synchronous>, transform_indices = @transform_5, window_bounds = array<i64: 1, 128>}, {pipeline_mode = #tpu.pipeline_mode<synchronous>, transform_indices = @transform_6, window_bounds = array<i64: 1, 128>}, {transform_indices = @transform_7, window_bounds = array<i64: 1, 8, 8, 128>}]} {
    %c8_i32 = arith.constant 8 : i32
    %0 = arith.muli %arg1, %c8_i32 : i32
    %cst = arith.constant 0.000000e+00 : f32
    %1 = vector.broadcast %cst : f32 to vector<64x128xf32>
    %c0_i32 = arith.constant 0 : i32
    %2 = arith.addi %0, %c0_i32 : i32
    %c0 = arith.constant 0 : index
    %3 = arith.index_cast %2 : i32 to index
    %c0_0 = arith.constant 0 : index
    %c0_1 = arith.constant 0 : index
    %4 = vector.load %arg2[%c0, %3, %c0_0, %c0_1] : memref<1x9x9x128xbf16, #tpu.memory_space<vmem>>, vector<1x8x8x128xbf16>
    %5 = vector.shape_cast %4 : vector<1x8x8x128xbf16> to vector<8x8x128xbf16>
    %6 = vector.shape_cast %5 : vector<8x8x128xbf16> to vector<64x128xbf16>
    %c0_2 = arith.constant 0 : index
    %c0_3 = arith.constant 0 : index
    %c0_4 = arith.constant 0 : index
    %7 = vector.load %arg6[%c0_2, %c0_3, %c0_4] : memref<9x128x128xbf16, #tpu.memory_space<vmem>>, vector<1x128x128xbf16>
    %8 = vector.shape_cast %7 : vector<1x128x128xbf16> to vector<128x128xbf16>
    %cst_5 = arith.constant dense<0.000000e+00> : vector<64x128xf32>
    %9 = tpu.matmul %6, %8, %cst_5 {dimension_numbers = #tpu.dot_dimension_numbers<[1], [0], [0], [1], [0, 0, 1, 1], [], []>} : vector<64x128xbf16>, vector<128x128xbf16>, vector<64x128xf32> -> vector<64x128xf32>
    %10 = arith.addf %1, %9 : vector<64x128xf32>
    %c0_i32_6 = arith.constant 0 : i32
    %11 = arith.addi %0, %c0_i32_6 : i32
    %c0_7 = arith.constant 0 : index
    %12 = arith.index_cast %11 : i32 to index
    %c0_8 = arith.constant 0 : index
    %c0_9 = arith.constant 0 : index
    %13 = vector.load %arg3[%c0_7, %12, %c0_8, %c0_9] : memref<1x9x9x128xbf16, #tpu.memory_space<vmem>>, vector<1x8x8x128xbf16>
    %14 = vector.shape_cast %13 : vector<1x8x8x128xbf16> to vector<8x8x128xbf16>
    %15 = vector.shape_cast %14 : vector<8x8x128xbf16> to vector<64x128xbf16>
    %c1 = arith.constant 1 : index
    %c0_10 = arith.constant 0 : index
    %c0_11 = arith.constant 0 : index
    %16 = vector.load %arg6[%c1, %c0_10, %c0_11] : memref<9x128x128xbf16, #tpu.memory_space<vmem>>, vector<1x128x128xbf16>
    %17 = vector.shape_cast %16 : vector<1x128x128xbf16> to vector<128x128xbf16>
    %cst_12 = arith.constant dense<0.000000e+00> : vector<64x128xf32>
    %18 = tpu.matmul %15, %17, %cst_12 {dimension_numbers = #tpu.dot_dimension_numbers<[1], [0], [0], [1], [0, 0, 1, 1], [], []>} : vector<64x128xbf16>, vector<128x128xbf16>, vector<64x128xf32> -> vector<64x128xf32>
    %19 = arith.addf %10, %18 : vector<64x128xf32>
    %c0_i32_13 = arith.constant 0 : i32
    %20 = arith.addi %0, %c0_i32_13 : i32
    %c0_14 = arith.constant 0 : index
    %21 = arith.index_cast %20 : i32 to index
    %c1_15 = arith.constant 1 : index
    %c0_16 = arith.constant 0 : index
    %22 = vector.load %arg2[%c0_14, %21, %c1_15, %c0_16] : memref<1x9x9x128xbf16, #tpu.memory_space<vmem>>, vector<1x8x8x128xbf16>
    %23 = vector.shape_cast %22 : vector<1x8x8x128xbf16> to vector<8x8x128xbf16>
    %24 = vector.shape_cast %23 : vector<8x8x128xbf16> to vector<64x128xbf16>
    %c2 = arith.constant 2 : index
    %c0_17 = arith.constant 0 : index
    %c0_18 = arith.constant 0 : index
    %25 = vector.load %arg6[%c2, %c0_17, %c0_18] : memref<9x128x128xbf16, #tpu.memory_space<vmem>>, vector<1x128x128xbf16>
    %26 = vector.shape_cast %25 : vector<1x128x128xbf16> to vector<128x128xbf16>
    %cst_19 = arith.constant dense<0.000000e+00> : vector<64x128xf32>
    %27 = tpu.matmul %24, %26, %cst_19 {dimension_numbers = #tpu.dot_dimension_numbers<[1], [0], [0], [1], [0, 0, 1, 1], [], []>} : vector<64x128xbf16>, vector<128x128xbf16>, vector<64x128xf32> -> vector<64x128xf32>
    %28 = arith.addf %19, %27 : vector<64x128xf32>
    %c0_i32_20 = arith.constant 0 : i32
    %29 = arith.addi %0, %c0_i32_20 : i32
    %c0_21 = arith.constant 0 : index
    %30 = arith.index_cast %29 : i32 to index
    %c0_22 = arith.constant 0 : index
    %c0_23 = arith.constant 0 : index
    %31 = vector.load %arg4[%c0_21, %30, %c0_22, %c0_23] : memref<1x9x9x128xbf16, #tpu.memory_space<vmem>>, vector<1x8x8x128xbf16>
    %32 = vector.shape_cast %31 : vector<1x8x8x128xbf16> to vector<8x8x128xbf16>
    %33 = vector.shape_cast %32 : vector<8x8x128xbf16> to vector<64x128xbf16>
    %c3 = arith.constant 3 : index
    %c0_24 = arith.constant 0 : index
    %c0_25 = arith.constant 0 : index
    %34 = vector.load %arg6[%c3, %c0_24, %c0_25] : memref<9x128x128xbf16, #tpu.memory_space<vmem>>, vector<1x128x128xbf16>
    %35 = vector.shape_cast %34 : vector<1x128x128xbf16> to vector<128x128xbf16>
    %cst_26 = arith.constant dense<0.000000e+00> : vector<64x128xf32>
    %36 = tpu.matmul %33, %35, %cst_26 {dimension_numbers = #tpu.dot_dimension_numbers<[1], [0], [0], [1], [0, 0, 1, 1], [], []>} : vector<64x128xbf16>, vector<128x128xbf16>, vector<64x128xf32> -> vector<64x128xf32>
    %37 = arith.addf %28, %36 : vector<64x128xf32>
    %c0_i32_27 = arith.constant 0 : i32
    %38 = arith.addi %0, %c0_i32_27 : i32
    %c0_28 = arith.constant 0 : index
    %39 = arith.index_cast %38 : i32 to index
    %c0_29 = arith.constant 0 : index
    %c0_30 = arith.constant 0 : index
    %40 = vector.load %arg5[%c0_28, %39, %c0_29, %c0_30] : memref<1x9x9x128xbf16, #tpu.memory_space<vmem>>, vector<1x8x8x128xbf16>
    %41 = vector.shape_cast %40 : vector<1x8x8x128xbf16> to vector<8x8x128xbf16>
    %42 = vector.shape_cast %41 : vector<8x8x128xbf16> to vector<64x128xbf16>
    %c4 = arith.constant 4 : index
    %c0_31 = arith.constant 0 : index
    %c0_32 = arith.constant 0 : index
    %43 = vector.load %arg6[%c4, %c0_31, %c0_32] : memref<9x128x128xbf16, #tpu.memory_space<vmem>>, vector<1x128x128xbf16>
    %44 = vector.shape_cast %43 : vector<1x128x128xbf16> to vector<128x128xbf16>
    %cst_33 = arith.constant dense<0.000000e+00> : vector<64x128xf32>
    %45 = tpu.matmul %42, %44, %cst_33 {dimension_numbers = #tpu.dot_dimension_numbers<[1], [0], [0], [1], [0, 0, 1, 1], [], []>} : vector<64x128xbf16>, vector<128x128xbf16>, vector<64x128xf32> -> vector<64x128xf32>
    %46 = arith.addf %37, %45 : vector<64x128xf32>
    %c0_i32_34 = arith.constant 0 : i32
    %47 = arith.addi %0, %c0_i32_34 : i32
    %c0_35 = arith.constant 0 : index
    %48 = arith.index_cast %47 : i32 to index
    %c1_36 = arith.constant 1 : index
    %c0_37 = arith.constant 0 : index
    %49 = vector.load %arg4[%c0_35, %48, %c1_36, %c0_37] : memref<1x9x9x128xbf16, #tpu.memory_space<vmem>>, vector<1x8x8x128xbf16>
    %50 = vector.shape_cast %49 : vector<1x8x8x128xbf16> to vector<8x8x128xbf16>
    %51 = vector.shape_cast %50 : vector<8x8x128xbf16> to vector<64x128xbf16>
    %c5 = arith.constant 5 : index
    %c0_38 = arith.constant 0 : index
    %c0_39 = arith.constant 0 : index
    %52 = vector.load %arg6[%c5, %c0_38, %c0_39] : memref<9x128x128xbf16, #tpu.memory_space<vmem>>, vector<1x128x128xbf16>
    %53 = vector.shape_cast %52 : vector<1x128x128xbf16> to vector<128x128xbf16>
    %cst_40 = arith.constant dense<0.000000e+00> : vector<64x128xf32>
    %54 = tpu.matmul %51, %53, %cst_40 {dimension_numbers = #tpu.dot_dimension_numbers<[1], [0], [0], [1], [0, 0, 1, 1], [], []>} : vector<64x128xbf16>, vector<128x128xbf16>, vector<64x128xf32> -> vector<64x128xf32>
    %55 = arith.addf %46, %54 : vector<64x128xf32>
    %c1_i32 = arith.constant 1 : i32
    %56 = arith.addi %0, %c1_i32 : i32
    %c0_41 = arith.constant 0 : index
    %57 = arith.index_cast %56 : i32 to index
    %c0_42 = arith.constant 0 : index
    %c0_43 = arith.constant 0 : index
    %58 = vector.load %arg2[%c0_41, %57, %c0_42, %c0_43] : memref<1x9x9x128xbf16, #tpu.memory_space<vmem>>, vector<1x8x8x128xbf16>
    %59 = vector.shape_cast %58 : vector<1x8x8x128xbf16> to vector<8x8x128xbf16>
    %60 = vector.shape_cast %59 : vector<8x8x128xbf16> to vector<64x128xbf16>
    %c6 = arith.constant 6 : index
    %c0_44 = arith.constant 0 : index
    %c0_45 = arith.constant 0 : index
    %61 = vector.load %arg6[%c6, %c0_44, %c0_45] : memref<9x128x128xbf16, #tpu.memory_space<vmem>>, vector<1x128x128xbf16>
    %62 = vector.shape_cast %61 : vector<1x128x128xbf16> to vector<128x128xbf16>
    %cst_46 = arith.constant dense<0.000000e+00> : vector<64x128xf32>
    %63 = tpu.matmul %60, %62, %cst_46 {dimension_numbers = #tpu.dot_dimension_numbers<[1], [0], [0], [1], [0, 0, 1, 1], [], []>} : vector<64x128xbf16>, vector<128x128xbf16>, vector<64x128xf32> -> vector<64x128xf32>
    %64 = arith.addf %55, %63 : vector<64x128xf32>
    %c1_i32_47 = arith.constant 1 : i32
    %65 = arith.addi %0, %c1_i32_47 : i32
    %c0_48 = arith.constant 0 : index
    %66 = arith.index_cast %65 : i32 to index
    %c0_49 = arith.constant 0 : index
    %c0_50 = arith.constant 0 : index
    %67 = vector.load %arg3[%c0_48, %66, %c0_49, %c0_50] : memref<1x9x9x128xbf16, #tpu.memory_space<vmem>>, vector<1x8x8x128xbf16>
    %68 = vector.shape_cast %67 : vector<1x8x8x128xbf16> to vector<8x8x128xbf16>
    %69 = vector.shape_cast %68 : vector<8x8x128xbf16> to vector<64x128xbf16>
    %c7 = arith.constant 7 : index
    %c0_51 = arith.constant 0 : index
    %c0_52 = arith.constant 0 : index
    %70 = vector.load %arg6[%c7, %c0_51, %c0_52] : memref<9x128x128xbf16, #tpu.memory_space<vmem>>, vector<1x128x128xbf16>
    %71 = vector.shape_cast %70 : vector<1x128x128xbf16> to vector<128x128xbf16>
    %cst_53 = arith.constant dense<0.000000e+00> : vector<64x128xf32>
    %72 = tpu.matmul %69, %71, %cst_53 {dimension_numbers = #tpu.dot_dimension_numbers<[1], [0], [0], [1], [0, 0, 1, 1], [], []>} : vector<64x128xbf16>, vector<128x128xbf16>, vector<64x128xf32> -> vector<64x128xf32>
    %73 = arith.addf %64, %72 : vector<64x128xf32>
    %c1_i32_54 = arith.constant 1 : i32
    %74 = arith.addi %0, %c1_i32_54 : i32
    %c0_55 = arith.constant 0 : index
    %75 = arith.index_cast %74 : i32 to index
    %c1_56 = arith.constant 1 : index
    %c0_57 = arith.constant 0 : index
    %76 = vector.load %arg2[%c0_55, %75, %c1_56, %c0_57] : memref<1x9x9x128xbf16, #tpu.memory_space<vmem>>, vector<1x8x8x128xbf16>
    %77 = vector.shape_cast %76 : vector<1x8x8x128xbf16> to vector<8x8x128xbf16>
    %78 = vector.shape_cast %77 : vector<8x8x128xbf16> to vector<64x128xbf16>
    %c8 = arith.constant 8 : index
    %c0_58 = arith.constant 0 : index
    %c0_59 = arith.constant 0 : index
    %79 = vector.load %arg6[%c8, %c0_58, %c0_59] : memref<9x128x128xbf16, #tpu.memory_space<vmem>>, vector<1x128x128xbf16>
    %80 = vector.shape_cast %79 : vector<1x128x128xbf16> to vector<128x128xbf16>
    %cst_60 = arith.constant dense<0.000000e+00> : vector<64x128xf32>
    %81 = tpu.matmul %78, %80, %cst_60 {dimension_numbers = #tpu.dot_dimension_numbers<[1], [0], [0], [1], [0, 0, 1, 1], [], []>} : vector<64x128xbf16>, vector<128x128xbf16>, vector<64x128xf32> -> vector<64x128xf32>
    %82 = arith.addf %73, %81 : vector<64x128xf32>
    %c0_61 = arith.constant 0 : index
    %c0_62 = arith.constant 0 : index
    %83 = vector.load %arg7[%c0_61, %c0_62] : memref<1x128xf32, #tpu.memory_space<vmem>>, vector<1x128xf32>
    %84 = vector.broadcast %83 : vector<1x128xf32> to vector<64x128xf32>
    %85 = arith.mulf %82, %84 : vector<64x128xf32>
    %c0_63 = arith.constant 0 : index
    %c0_64 = arith.constant 0 : index
    %86 = vector.load %arg8[%c0_63, %c0_64] : memref<1x128xf32, #tpu.memory_space<vmem>>, vector<1x128xf32>
    %87 = vector.broadcast %86 : vector<1x128xf32> to vector<64x128xf32>
    %88 = arith.addf %85, %87 : vector<64x128xf32>
    %cst_65 = arith.constant 0.000000e+00 : f32
    %89 = vector.broadcast %cst_65 : f32 to vector<64x128xf32>
    %90 = arith.maximumf %88, %89 : vector<64x128xf32>
    %91 = vector.shape_cast %90 : vector<64x128xf32> to vector<1x8x8x128xf32>
    %92 = arith.truncf %91 : vector<1x8x8x128xf32> to vector<1x8x8x128xbf16>
    %c0_66 = arith.constant 0 : index
    %c0_67 = arith.constant 0 : index
    %c0_68 = arith.constant 0 : index
    %c0_69 = arith.constant 0 : index
    %93 = vector.load %arg9[%c0_66, %c0_67, %c0_68, %c0_69] : memref<1x8x8x128xbf16, #tpu.memory_space<vmem>>, vector<1x8x8x128xbf16>
    tpu.vector_store %arg9[%c0_66, %c0_67, %c0_68, %c0_69], %92 {strides = array<i32>} : memref<1x8x8x128xbf16, #tpu.memory_space<vmem>>, vector<1x8x8x128xbf16>,
    return
  }
  func.func @transform_0(%arg0: i32, %arg1: i32) -> (i32, i32, i32, i32) {
    %c0_i32 = arith.constant 0 : i32
    %c0_i32_0 = arith.constant 0 : i32
    %c0_i32_1 = arith.constant 0 : i32
    %c0_i32_2 = arith.constant 0 : i32
    return %arg0, %c0_i32, %c0_i32_0, %c0_i32_1 : i32, i32, i32, i32
  }
  func.func @transform_1(%arg0: i32, %arg1: i32) -> (i32, i32, i32, i32) {
    %c0_i32 = arith.constant 0 : i32
    %c0_i32_0 = arith.constant 0 : i32
    %c0_i32_1 = arith.constant 0 : i32
    %c0_i32_2 = arith.constant 0 : i32
    return %arg0, %c0_i32, %c0_i32_0, %c0_i32_1 : i32, i32, i32, i32
  }
  func.func @transform_2(%arg0: i32, %arg1: i32) -> (i32, i32, i32, i32) {
    %c0_i32 = arith.constant 0 : i32
    %c0_i32_0 = arith.constant 0 : i32
    %c0_i32_1 = arith.constant 0 : i32
    %c0_i32_2 = arith.constant 0 : i32
    return %arg0, %c0_i32, %c0_i32_0, %c0_i32_1 : i32, i32, i32, i32
  }
  func.func @transform_3(%arg0: i32, %arg1: i32) -> (i32, i32, i32, i32) {
    %c0_i32 = arith.constant 0 : i32
    %c0_i32_0 = arith.constant 0 : i32
    %c0_i32_1 = arith.constant 0 : i32
    %c0_i32_2 = arith.constant 0 : i32
    return %arg0, %c0_i32, %c0_i32_0, %c0_i32_1 : i32, i32, i32, i32
  }
  func.func @transform_4(%arg0: i32, %arg1: i32) -> (i32, i32, i32) {
    %c0_i32 = arith.constant 0 : i32
    %c0_i32_0 = arith.constant 0 : i32
    %c0_i32_1 = arith.constant 0 : i32
    %c0_i32_2 = arith.constant 0 : i32
    return %c0_i32, %c0_i32_0, %c0_i32_1 : i32, i32, i32
  }
  func.func @transform_5(%arg0: i32, %arg1: i32) -> (i32, i32) {
    %c0_i32 = arith.constant 0 : i32
    %c0_i32_0 = arith.constant 0 : i32
    %c0_i32_1 = arith.constant 0 : i32
    return %c0_i32, %c0_i32_0 : i32, i32
  }
  func.func @transform_6(%arg0: i32, %arg1: i32) -> (i32, i32) {
    %c0_i32 = arith.constant 0 : i32
    %c0_i32_0 = arith.constant 0 : i32
    %c0_i32_1 = arith.constant 0 : i32
    return %c0_i32, %c0_i32_0 : i32, i32
  }
  func.func @transform_7(%arg0: i32, %arg1: i32) -> (i32, i32, i32, i32) {
    %c0_i32 = arith.constant 0 : i32
    %c0_i32_0 = arith.constant 0 : i32
    %c0_i32_1 = arith.constant 0 : i32
    return %arg0, %arg1, %c0_i32, %c0_i32_0 : i32, i32, i32, i32
  }
}

</mosaic_0001>

<bundles_post_ra>
// kernel: _lambda_.3
= control target key start
LH: loop header
LB: loop body
LE: loop exit
PB: predicated region body
PF: predicated region fallthrough
CT: control target
= control target key end

     0   :  { %s2073_s1 = inlined_call_operand.vmem [shape: bf16[128,128], index: 1, kind: input, shape index: {}]   ;;  %s2074_s0 = inlined_call_operand.vmem [shape: bf16[512,128], index: 0, kind: input, shape index: {}]   ;;  %s2075_s2 = inlined_call_operand.vmem [shape: f32[1,128], index: 2, kind: input, shape index: {}]   ;;  %s2076_s3 = inlined_call_operand.vmem [shape: f32[1,128], index: 3, kind: input, shape index: {}]   ;;  %s2077_s4 = inlined_call_operand.vmem [shape: bf16[512,128], index: 4, kind: output, shape index: {}]  }
   0x1   :  { %v1654_v0 = vld [vmem:[%s2073_s1] sm:$0xff]   ;;  %v1655_v1 = vld [vmem:[%s2073_s1 + $0x8] sm:$0xff]   ;;  %v1656_v2 = vld [vmem:[%s2073_s1 + $0x10] sm:$0xff]  }
   0x2   :  { %1558 = vmatprep.subr.bf16.mxu0 %v1654_v0  ;;  %1638 = vmatprep.subr.bf16.mxu1 %v1654_v0  ;;  %v1657_v3 = vld [vmem:[%s2073_s1 + $0x18] sm:$0xff]   ;;  %v1662_v4 = vld [vmem:[%s2074_s0] sm:$0xff]   ;;  %v1659_v7 = vld [vmem:[%s2073_s1 + $0x28] sm:$0xff]  }
   0x3   :  { %1559 = vmatpush3.bf16.msra.mxu0 %v1654_v0  ;;  %1646 = vmatpush3.bf16.msra.mxu1 %v1654_v0  ;;  %v1663_v5 = vld [vmem:[%s2074_s0 + $0x80] sm:$0xff]   ;;  %v1660_v8 = vld [vmem:[%s2073_s1 + $0x30] sm:$0xff]   ;;  %v1661_v9 = vld [vmem:[%s2073_s1 + $0x38] sm:$0xff]  }
   0x4   :  { %1560 = vmatprep.subr.bf16.mxu0 %v1655_v1  ;;  %1639 = vmatprep.subr.bf16.mxu1 %v1655_v1  ;;  %v1658_v6 = vld [vmem:[%s2073_s1 + $0x20] sm:$0xff]   ;;  %v1664_v10 = vld [vmem:[%s2074_s0 + $0x8] sm:$0xff]   ;;  %v1666_v12 = vld [vmem:[%s2074_s0 + $0x10] sm:$0xff]  }
   0x5   :  { %1574 = vmatprep.mubr.bf16.mxu0 %v1662_v4  ;;  %1606 = vmatprep.mubr.bf16.mxu1 %v1663_v5  ;;  %v1665_v11 = vld [vmem:[%s2074_s0 + $0x88] sm:$0xff]   ;;  %v1667_v13 = vld [vmem:[%s2074_s0 + $0x90] sm:$0xff]   ;;  %v1668_v14 = vld [vmem:[%s2074_s0 + $0x18] sm:$0xff]  }
   0x6   :  { %v1669_v15 = vld [vmem:[%s2074_s0 + $0x98] sm:$0xff]   ;;  %v1670_v16 = vld [vmem:[%s2074_s0 + $0x20] sm:$0xff]   ;;  %v1672_v18 = vld [vmem:[%s2074_s0 + $0x28] sm:$0xff]  }
   0x7   :  { %1561 = vmatpush3.bf16.msra.mxu0 %v1655_v1  ;;  %1647 = vmatpush3.bf16.msra.mxu1 %v1655_v1  ;;  %v1671_v17 = vld [vmem:[%s2074_s0 + $0xa0] sm:$0xff]   ;;  %v1673_v19 = vld [vmem:[%s2074_s0 + $0xa8] sm:$0xff]   ;;  %v1674_v20 = vld [vmem:[%s2074_s0 + $0x30] sm:$0xff]  }
   0x8   :  { %1562 = vmatprep.subr.bf16.mxu0 %v1656_v2  ;;  %1640 = vmatprep.subr.bf16.mxu1 %v1656_v2  ;;  %v1675_v21 = vld [vmem:[%s2074_s0 + $0xb0] sm:$0xff]   ;;  %v1676_v22 = vld [vmem:[%s2074_s0 + $0x38] sm:$0xff]   ;;  %v1678_v24 = vld [vmem:[%s2074_s0 + $0x40] sm:$0xff]  }
   0x9   :  { %v1677_v23 = vld [vmem:[%s2074_s0 + $0xb8] sm:$0xff]   ;;  %v1679_v25 = vld [vmem:[%s2074_s0 + $0xc0] sm:$0xff]   ;;  %v1680_v26 = vld [vmem:[%s2074_s0 + $0x48] sm:$0xff]  }
   0xa   :  { %v1681_v27 = vld [vmem:[%s2074_s0 + $0xc8] sm:$0xff]   ;;  %v1682_v28 = vld [vmem:[%s2074_s0 + $0x50] sm:$0xff]   ;;  %v1684_v30 = vld [vmem:[%s2074_s0 + $0x58] sm:$0xff]  }
   0xb   :  { %1563 = vmatpush3.bf16.msra.mxu0 %v1656_v2  ;;  %1648 = vmatpush3.bf16.msra.mxu1 %v1656_v2  ;;  %v1683_v29 = vld [vmem:[%s2074_s0 + $0xd0] sm:$0xff]   ;;  %v1685_v31 = vld [vmem:[%s2074_s0 + $0xd8] sm:$0xff]   ;;  %v1686_v32 = vld [vmem:[%s2074_s0 + $0x60] sm:$0xff]  }
   0xc   :  { %1564 = vmatprep.subr.bf16.mxu0 %v1657_v3  ;;  %1641 = vmatprep.subr.bf16.mxu1 %v1657_v3  ;;  %v1687_v33 = vld [vmem:[%s2074_s0 + $0xe0] sm:$0xff]   ;;  %v1688_v34 = vld [vmem:[%s2074_s0 + $0x68] sm:$0xff]   ;;  %v1690_v36 = vld [vmem:[%s2074_s0 + $0x70] sm:$0xff]  }
   0xd   :  { %v1689_v35 = vld [vmem:[%s2074_s0 + $0xe8] sm:$0xff]   ;;  %v1691_v37 = vld [vmem:[%s2074_s0 + $0xf0] sm:$0xff]   ;;  %v1692_v38 = vld [vmem:[%s2074_s0 + $0x78] sm:$0xff]  }
   0xe   :  { %v1693_v39 = vld [vmem:[%s2074_s0 + $0xf8] sm:$0xff]   ;;  %v1842_v40 = vld [vmem:[%s2075_s2] ss:$0 sm:$0xff] }
   0xf   :  { %1565 = vmatpush3.bf16.msra.mxu0 %v1657_v3  ;;  %1649 = vmatpush3.bf16.msra.mxu1 %v1657_v3  ;;  %v1847_v42 = vld [vmem:[%s2076_s3] ss:$0 sm:$0xff] }
  0x10   :  { %1566 = vmatprep.subr.bf16.mxu0 %v1658_v6  ;;  %1642 = vmatprep.subr.bf16.mxu1 %v1658_v6 }
  0x13   :  { %1567 = vmatpush3.bf16.msra.mxu0 %v1658_v6  ;;  %1650 = vmatpush3.bf16.msra.mxu1 %v1658_v6 }
  0x14   :  { %1568 = vmatprep.subr.bf16.mxu0 %v1659_v7  ;;  %1643 = vmatprep.subr.bf16.mxu1 %v1659_v7 }
  0x17   :  { %1569 = vmatpush3.bf16.msra.mxu0 %v1659_v7  ;;  %1651 = vmatpush3.bf16.msra.mxu1 %v1659_v7 }
  0x18   :  { %1570 = vmatprep.subr.bf16.mxu0 %v1660_v8  ;;  %1644 = vmatprep.subr.bf16.mxu1 %v1660_v8 }
  0x1b   :  { %1571 = vmatpush3.bf16.msra.mxu0 %v1660_v8  ;;  %1652 = vmatpush3.bf16.msra.mxu1 %v1660_v8 }
  0x1c   :  { %1572 = vmatprep.subr.bf16.mxu0 %v1661_v9  ;;  %1645 = vmatprep.subr.bf16.mxu1 %v1661_v9 }
  0x1f   :  { %1573 = vmatpush3.bf16.msra.mxu0 %v1661_v9  ;;  %1653 = vmatpush3.bf16.msra.mxu1 %v1661_v9 }
  0x22   :  { %1575 = vmatmul.mubr.bf16.vlgmr.msra.gmra.mrb[0].mxu0 %v1664_v10  ;;  %1607 = vmatmul.mubr.bf16.vlgmr.msra.gmra.mrb[0].mxu1 %v1665_v11 }
  0x23   :  { %1578 = vmatprep.mubr.bf16.mxu0 %v1666_v12  ;;  %1610 = vmatprep.mubr.bf16.mxu1 %v1667_v13 }
  0x2a   :  { %1579 = vmatmul.mubr.bf16.gmra.mrb[4].mxu0 %v1668_v14  ;;  %1611 = vmatmul.mubr.bf16.gmra.mrb[4].mxu1 %v1669_v15 }
  0x2b   :  { %1582 = vmatprep.mubr.bf16.mxu0 %v1670_v16  ;;  %1614 = vmatprep.mubr.bf16.mxu1 %v1671_v17 }
  0x32   :  { %1583 = vmatmul.mubr.bf16.gmra.mrb[8].mxu0 %v1672_v18  ;;  %1615 = vmatmul.mubr.bf16.gmra.mrb[8].mxu1 %v1673_v19 }
  0x33   :  { %1586 = vmatprep.mubr.bf16.mxu0 %v1674_v20  ;;  %1618 = vmatprep.mubr.bf16.mxu1 %v1675_v21 }
  0x3a   :  { %1587 = vmatmul.mubr.bf16.gmra.mrb[12].mxu0 %v1676_v22  ;;  %1619 = vmatmul.mubr.bf16.gmra.mrb[12].mxu1 %v1677_v23 }
  0x3b   :  { %1590 = vmatprep.mubr.bf16.mxu0 %v1678_v24  ;;  %1622 = vmatprep.mubr.bf16.mxu1 %v1679_v25 }
  0x42   :  { %1591 = vmatmul.mubr.bf16.gmra.mrb[16].mxu0 %v1680_v26  ;;  %1623 = vmatmul.mubr.bf16.gmra.mrb[16].mxu1 %v1681_v27 }
  0x43   :  { %1594 = vmatprep.mubr.bf16.mxu0 %v1682_v28  ;;  %1626 = vmatprep.mubr.bf16.mxu1 %v1683_v29 }
  0x4a   :  { %1595 = vmatmul.mubr.bf16.gmra.mrb[20].mxu0 %v1684_v30  ;;  %1627 = vmatmul.mubr.bf16.gmra.mrb[20].mxu1 %v1685_v31 }
  0x4b   :  { %1598 = vmatprep.mubr.bf16.mxu0 %v1686_v32  ;;  %1630 = vmatprep.mubr.bf16.mxu1 %v1687_v33 }
  0x52   :  { %1599 = vmatmul.mubr.bf16.gmra.mrb[24].mxu0 %v1688_v34  ;;  %1631 = vmatmul.mubr.bf16.gmra.mrb[24].mxu1 %v1689_v35 }
  0x53   :  { %1602 = vmatprep.mubr.bf16.mxu0 %v1690_v36  ;;  %1634 = vmatprep.mubr.bf16.mxu1 %v1691_v37 }
  0x5a   :  { %1603 = vmatmul.mubr.bf16.gmra.mrb[28].mxu0 %v1692_v38  ;;  %1635 = vmatmul.mubr.bf16.gmra.mrb[28].mxu1 %v1693_v39 }
  0xf5   :  { %v1576_v41 = vpop.f32.mrb[0].mxu0  ;;  %v1608_v43 = vpop.f32.mrb[0].mxu1 }
  0xf6   :  { %v636_v44 = vmul.f32 %v1576_v41, %v1842_v40  ;;  %v668_v45 = vmul.f32 %v1608_v43, %v1842_v40  ;;  %v372_v46 = vpop.f32.mrb[1].mxu0  ;;  %v500_v47 = vpop.f32.mrb[1].mxu1 }
  0xf7   :  { %v634_v48 = vmul.f32 %v1842_v40, %v372_v46  ;;  %v666_v49 = vmul.f32 %v1842_v40, %v500_v47  ;;  %v1577_v50 = vpop.f32.mrb[2].mxu0  ;;  %v1609_v51 = vpop.f32.mrb[2].mxu1 }
  0xf8   :  { %v707_v52 = vadd.f32 %v1847_v42, %v636_v44  ;;  %v739_v53 = vadd.f32 %v1847_v42, %v668_v45  ;;  %v637_v54 = vmul.f32 %v1577_v50, %v1842_v40  ;;  %v669_v55 = vmul.f32 %v1609_v51, %v1842_v40  ;;  %v375_v56 = vpop.f32.mrb[3].mxu0  ;;  %v503_v57 = vpop.f32.mrb[3].mxu1 }
  0xf9   :  { %v705_v58 = vadd.f32 %v1847_v42, %v634_v48  ;;  %v737_v59 = vadd.f32 %v1847_v42, %v666_v49  ;;  %v635_v60 = vmul.f32 %v1842_v40, %v375_v56  ;;  %v667_v61 = vmul.f32 %v1842_v40, %v503_v57 }
  0xfa   :  { %v708_v62 = vadd.f32 %v1847_v42, %v637_v54  ;;  %v740_v63 = vadd.f32 %v1847_v42, %v669_v55  ;;  %v771_v2 = vmax.f32 %v707_v52, 0.0  ;;  %v803_v3 = vmax.f32 %v739_v53, 0.0 }
  0xfb   :  { %v706_v0 = vadd.f32 %v1847_v42, %v635_v60  ;;  %v738_v1 = vadd.f32 %v1847_v42, %v667_v61  ;;  %v769_v6 = vmax.f32 %v705_v58, 0.0  ;;  %v801_v7 = vmax.f32 %v737_v59, 0.0 }
  0xfc   :  { %v772_v4 = vmax.f32 %v708_v62, 0.0  ;;  %v804_v5 = vmax.f32 %v740_v63, 0.0 }
  0xfd   :  { %v770_v8 = vmax.f32 %v706_v0, 0.0  ;;  %v802_v9 = vmax.f32 %v738_v1, 0.0  ;;  %v1580_v10 = vpop.f32.mrb[4].mxu0  ;;  %v1612_v11 = vpop.f32.mrb[4].mxu1 }
  0xfe   :  { %v1335_v12 = vpack.c.bf16 %v772_v4, %v771_v2  ;;  %v1415_v13 = vpack.c.bf16 %v804_v5, %v803_v3  ;;  %v640_v14 = vmul.f32 %v1580_v10, %v1842_v40  ;;  %v672_v15 = vmul.f32 %v1612_v11, %v1842_v40  ;;  %v388_v16 = vpop.f32.mrb[5].mxu0  ;;  %v516_v17 = vpop.f32.mrb[5].mxu1 }
  0xff   :  { %v1330_v18 = vpack.c.bf16 %v770_v8, %v769_v6  ;;  %v1410_v19 = vpack.c.bf16 %v802_v9, %v801_v7  ;;  %v638_v20 = vmul.f32 %v1842_v40, %v388_v16  ;;  %v670_v21 = vmul.f32 %v1842_v40, %v516_v17  ;;  %v1581_v22 = vpop.f32.mrb[6].mxu0  ;;  %v1613_v23 = vpop.f32.mrb[6].mxu1 }
 0x100   :  { %1487 = vst [vmem:[%s2077_s4 + $0x8] sm:$0xff] %v1335_v12   ;;  %1503 = vst [vmem:[%s2077_s4 + $0x88] sm:$0xff] %v1415_v13   ;;  %v711_v24 = vadd.f32 %v1847_v42, %v640_v14  ;;  %v743_v25 = vadd.f32 %v1847_v42, %v672_v15  ;;  %v641_v26 = vmul.f32 %v1581_v22, %v1842_v40  ;;  %v391_v28 = vpop.f32.mrb[7].mxu0  ;;  %v519_v29 = vpop.f32.mrb[7].mxu1 }
 0x101   :  { %v673_v27 = vmul.f32 %v1613_v23, %v1842_v40  ;;  %1331 = vst [vmem:[%s2077_s4] sm:$0xff] %v1330_v18   ;;  %1502 = vst [vmem:[%s2077_s4 + $0x80] sm:$0xff] %v1410_v19   ;;  %v709_v30 = vadd.f32 %v1847_v42, %v638_v20  ;;  %v741_v31 = vadd.f32 %v1847_v42, %v670_v21 }
 0x102   :  { %v639_v32 = vmul.f32 %v1842_v40, %v391_v28  ;;  %v671_v33 = vmul.f32 %v1842_v40, %v519_v29  ;;  %v712_v34 = vadd.f32 %v1847_v42, %v641_v26  ;;  %v775_v38 = vmax.f32 %v711_v24, 0.0 }
 0x103   :  { %v744_v35 = vadd.f32 %v1847_v42, %v673_v27  ;;  %v807_v39 = vmax.f32 %v743_v25, 0.0  ;;  %v773_v44 = vmax.f32 %v709_v30, 0.0  ;;  %v805_v45 = vmax.f32 %v741_v31, 0.0 }
 0x104   :  { %v710_v36 = vadd.f32 %v1847_v42, %v639_v32  ;;  %v742_v37 = vadd.f32 %v1847_v42, %v671_v33  ;;  %v776_v41 = vmax.f32 %v712_v34, 0.0 }
 0x105   :  { %v808_v43 = vmax.f32 %v744_v35, 0.0  ;;  %v1584_v48 = vpop.f32.mrb[8].mxu0  ;;  %v1616_v49 = vpop.f32.mrb[8].mxu1 }
 0x106   :  { %v774_v46 = vmax.f32 %v710_v36, 0.0  ;;  %v806_v47 = vmax.f32 %v742_v37, 0.0  ;;  %v1345_v50 = vpack.c.bf16 %v776_v41, %v775_v38  ;;  %v644_v52 = vmul.f32 %v1584_v48, %v1842_v40  ;;  %v404_v54 = vpop.f32.mrb[9].mxu0  ;;  %v532_v55 = vpop.f32.mrb[9].mxu1 }
 0x107   :  { %v1425_v51 = vpack.c.bf16 %v808_v43, %v807_v39  ;;  %v676_v53 = vmul.f32 %v1616_v49, %v1842_v40  ;;  %v642_v58 = vmul.f32 %v1842_v40, %v404_v54  ;;  %v674_v59 = vmul.f32 %v1842_v40, %v532_v55  ;;  %v1585_v60 = vpop.f32.mrb[10].mxu0  ;;  %v1617_v61 = vpop.f32.mrb[10].mxu1 }
 0x108   :  { %v1340_v56 = vpack.c.bf16 %v774_v46, %v773_v44  ;;  %v1420_v57 = vpack.c.bf16 %v806_v47, %v805_v45  ;;  %1489 = vst [vmem:[%s2077_s4 + $0x18] sm:$0xff] %v1345_v50   ;;  %v715_v62 = vadd.f32 %v1847_v42, %v644_v52  ;;  %v645_v0 = vmul.f32 %v1585_v60, %v1842_v40  ;;  %v407_v2 = vpop.f32.mrb[11].mxu0  ;;  %v535_v3 = vpop.f32.mrb[11].mxu1 }
 0x109   :  { %1505 = vst [vmem:[%s2077_s4 + $0x98] sm:$0xff] %v1425_v51   ;;  %v747_v63 = vadd.f32 %v1847_v42, %v676_v53  ;;  %v677_v1 = vmul.f32 %v1617_v61, %v1842_v40  ;;  %v713_v4 = vadd.f32 %v1847_v42, %v642_v58  ;;  %v745_v5 = vadd.f32 %v1847_v42, %v674_v59 }
 0x10a   :  { %1488 = vst [vmem:[%s2077_s4 + $0x10] sm:$0xff] %v1340_v56   ;;  %1504 = vst [vmem:[%s2077_s4 + $0x90] sm:$0xff] %v1420_v57   ;;  %v643_v6 = vmul.f32 %v1842_v40, %v407_v2  ;;  %v675_v7 = vmul.f32 %v1842_v40, %v535_v3  ;;  %v716_v8 = vadd.f32 %v1847_v42, %v645_v0  ;;  %v779_v12 = vmax.f32 %v715_v62, 0.0 }
 0x10b   :  { %v748_v9 = vadd.f32 %v1847_v42, %v677_v1  ;;  %v811_v13 = vmax.f32 %v747_v63, 0.0  ;;  %v777_v16 = vmax.f32 %v713_v4, 0.0  ;;  %v809_v17 = vmax.f32 %v745_v5, 0.0 }
 0x10c   :  { %v714_v10 = vadd.f32 %v1847_v42, %v643_v6  ;;  %v746_v11 = vadd.f32 %v1847_v42, %v675_v7  ;;  %v780_v14 = vmax.f32 %v716_v8, 0.0 }
 0x10d   :  { %v812_v15 = vmax.f32 %v748_v9, 0.0  ;;  %v1588_v20 = vpop.f32.mrb[12].mxu0  ;;  %v1620_v21 = vpop.f32.mrb[12].mxu1 }
 0x10e   :  { %v778_v18 = vmax.f32 %v714_v10, 0.0  ;;  %v810_v19 = vmax.f32 %v746_v11, 0.0  ;;  %v1355_v22 = vpack.c.bf16 %v780_v14, %v779_v12  ;;  %v648_v24 = vmul.f32 %v1588_v20, %v1842_v40  ;;  %v420_v26 = vpop.f32.mrb[13].mxu0  ;;  %v548_v27 = vpop.f32.mrb[13].mxu1 }
 0x10f   :  { %v1435_v23 = vpack.c.bf16 %v812_v15, %v811_v13  ;;  %v680_v25 = vmul.f32 %v1620_v21, %v1842_v40  ;;  %v646_v30 = vmul.f32 %v1842_v40, %v420_v26  ;;  %v678_v31 = vmul.f32 %v1842_v40, %v548_v27  ;;  %v1589_v32 = vpop.f32.mrb[14].mxu0  ;;  %v1621_v33 = vpop.f32.mrb[14].mxu1 }
 0x110   :  { %v1350_v28 = vpack.c.bf16 %v778_v18, %v777_v16  ;;  %v1430_v29 = vpack.c.bf16 %v810_v19, %v809_v17  ;;  %1491 = vst [vmem:[%s2077_s4 + $0x28] sm:$0xff] %v1355_v22   ;;  %v719_v34 = vadd.f32 %v1847_v42, %v648_v24  ;;  %v649_v36 = vmul.f32 %v1589_v32, %v1842_v40  ;;  %v423_v38 = vpop.f32.mrb[15].mxu0  ;;  %v551_v39 = vpop.f32.mrb[15].mxu1 }
 0x111   :  { %1507 = vst [vmem:[%s2077_s4 + $0xa8] sm:$0xff] %v1435_v23   ;;  %v751_v35 = vadd.f32 %v1847_v42, %v680_v25  ;;  %v681_v37 = vmul.f32 %v1621_v33, %v1842_v40  ;;  %v717_v41 = vadd.f32 %v1847_v42, %v646_v30  ;;  %v749_v43 = vadd.f32 %v1847_v42, %v678_v31 }
 0x112   :  { %1490 = vst [vmem:[%s2077_s4 + $0x20] sm:$0xff] %v1350_v28   ;;  %1506 = vst [vmem:[%s2077_s4 + $0xa0] sm:$0xff] %v1430_v29   ;;  %v647_v44 = vmul.f32 %v1842_v40, %v423_v38  ;;  %v679_v45 = vmul.f32 %v1842_v40, %v551_v39  ;;  %v720_v46 = vadd.f32 %v1847_v42, %v649_v36  ;;  %v783_v50 = vmax.f32 %v719_v34, 0.0 }
 0x113   :  { %v752_v47 = vadd.f32 %v1847_v42, %v681_v37  ;;  %v815_v51 = vmax.f32 %v751_v35, 0.0  ;;  %v781_v54 = vmax.f32 %v717_v41, 0.0  ;;  %v813_v55 = vmax.f32 %v749_v43, 0.0 }
 0x114   :  { %v718_v48 = vadd.f32 %v1847_v42, %v647_v44  ;;  %v750_v49 = vadd.f32 %v1847_v42, %v679_v45  ;;  %v784_v52 = vmax.f32 %v720_v46, 0.0 }
 0x115   :  { %v816_v53 = vmax.f32 %v752_v47, 0.0  ;;  %v1592_v58 = vpop.f32.mrb[16].mxu0  ;;  %v1624_v59 = vpop.f32.mrb[16].mxu1 }
 0x116   :  { %v782_v56 = vmax.f32 %v718_v48, 0.0  ;;  %v814_v57 = vmax.f32 %v750_v49, 0.0  ;;  %v1365_v60 = vpack.c.bf16 %v784_v52, %v783_v50  ;;  %v652_v62 = vmul.f32 %v1592_v58, %v1842_v40  ;;  %v436_v0 = vpop.f32.mrb[17].mxu0  ;;  %v564_v1 = vpop.f32.mrb[17].mxu1 }
 0x117   :  { %v1445_v61 = vpack.c.bf16 %v816_v53, %v815_v51  ;;  %v684_v63 = vmul.f32 %v1624_v59, %v1842_v40  ;;  %v650_v4 = vmul.f32 %v1842_v40, %v436_v0  ;;  %v682_v5 = vmul.f32 %v1842_v40, %v564_v1  ;;  %v1593_v6 = vpop.f32.mrb[18].mxu0  ;;  %v1625_v7 = vpop.f32.mrb[18].mxu1 }
 0x118   :  { %v1360_v2 = vpack.c.bf16 %v782_v56, %v781_v54  ;;  %v1440_v3 = vpack.c.bf16 %v814_v57, %v813_v55  ;;  %1493 = vst [vmem:[%s2077_s4 + $0x38] sm:$0xff] %v1365_v60   ;;  %v723_v8 = vadd.f32 %v1847_v42, %v652_v62  ;;  %v653_v10 = vmul.f32 %v1593_v6, %v1842_v40  ;;  %v439_v12 = vpop.f32.mrb[19].mxu0  ;;  %v567_v13 = vpop.f32.mrb[19].mxu1 }
 0x119   :  { %1509 = vst [vmem:[%s2077_s4 + $0xb8] sm:$0xff] %v1445_v61   ;;  %v755_v9 = vadd.f32 %v1847_v42, %v684_v63  ;;  %v685_v11 = vmul.f32 %v1625_v7, %v1842_v40  ;;  %v721_v14 = vadd.f32 %v1847_v42, %v650_v4  ;;  %v753_v15 = vadd.f32 %v1847_v42, %v682_v5 }
 0x11a   :  { %1492 = vst [vmem:[%s2077_s4 + $0x30] sm:$0xff] %v1360_v2   ;;  %1508 = vst [vmem:[%s2077_s4 + $0xb0] sm:$0xff] %v1440_v3   ;;  %v651_v16 = vmul.f32 %v1842_v40, %v439_v12  ;;  %v683_v17 = vmul.f32 %v1842_v40, %v567_v13  ;;  %v724_v18 = vadd.f32 %v1847_v42, %v653_v10  ;;  %v787_v22 = vmax.f32 %v723_v8, 0.0 }
 0x11b   :  { %v756_v19 = vadd.f32 %v1847_v42, %v685_v11  ;;  %v819_v23 = vmax.f32 %v755_v9, 0.0  ;;  %v785_v26 = vmax.f32 %v721_v14, 0.0  ;;  %v817_v27 = vmax.f32 %v753_v15, 0.0 }
 0x11c   :  { %v722_v20 = vadd.f32 %v1847_v42, %v651_v16  ;;  %v754_v21 = vadd.f32 %v1847_v42, %v683_v17  ;;  %v788_v24 = vmax.f32 %v724_v18, 0.0 }
 0x11d   :  { %v820_v25 = vmax.f32 %v756_v19, 0.0  ;;  %v1596_v30 = vpop.f32.mrb[20].mxu0  ;;  %v1628_v31 = vpop.f32.mrb[20].mxu1 }
 0x11e   :  { %v786_v28 = vmax.f32 %v722_v20, 0.0  ;;  %v818_v29 = vmax.f32 %v754_v21, 0.0  ;;  %v1375_v32 = vpack.c.bf16 %v788_v24, %v787_v22  ;;  %v656_v34 = vmul.f32 %v1596_v30, %v1842_v40  ;;  %v452_v36 = vpop.f32.mrb[21].mxu0  ;;  %v580_v37 = vpop.f32.mrb[21].mxu1 }
 0x11f   :  { %v1455_v33 = vpack.c.bf16 %v820_v25, %v819_v23  ;;  %v688_v35 = vmul.f32 %v1628_v31, %v1842_v40  ;;  %v654_v41 = vmul.f32 %v1842_v40, %v452_v36  ;;  %v686_v43 = vmul.f32 %v1842_v40, %v580_v37  ;;  %v1597_v44 = vpop.f32.mrb[22].mxu0  ;;  %v1629_v45 = vpop.f32.mrb[22].mxu1 }
 0x120   :  { %v1370_v38 = vpack.c.bf16 %v786_v28, %v785_v26  ;;  %v1450_v39 = vpack.c.bf16 %v818_v29, %v817_v27  ;;  %1495 = vst [vmem:[%s2077_s4 + $0x48] sm:$0xff] %v1375_v32   ;;  %v727_v46 = vadd.f32 %v1847_v42, %v656_v34  ;;  %v657_v48 = vmul.f32 %v1597_v44, %v1842_v40  ;;  %v455_v50 = vpop.f32.mrb[23].mxu0  ;;  %v583_v51 = vpop.f32.mrb[23].mxu1 }
 0x121   :  { %1511 = vst [vmem:[%s2077_s4 + $0xc8] sm:$0xff] %v1455_v33   ;;  %v759_v47 = vadd.f32 %v1847_v42, %v688_v35  ;;  %v689_v49 = vmul.f32 %v1629_v45, %v1842_v40  ;;  %v725_v52 = vadd.f32 %v1847_v42, %v654_v41  ;;  %v757_v53 = vadd.f32 %v1847_v42, %v686_v43 }
 0x122   :  { %1494 = vst [vmem:[%s2077_s4 + $0x40] sm:$0xff] %v1370_v38   ;;  %1510 = vst [vmem:[%s2077_s4 + $0xc0] sm:$0xff] %v1450_v39   ;;  %v655_v54 = vmul.f32 %v1842_v40, %v455_v50  ;;  %v687_v55 = vmul.f32 %v1842_v40, %v583_v51  ;;  %v728_v56 = vadd.f32 %v1847_v42, %v657_v48  ;;  %v791_v60 = vmax.f32 %v727_v46, 0.0 }
 0x123   :  { %v760_v57 = vadd.f32 %v1847_v42, %v689_v49  ;;  %v823_v61 = vmax.f32 %v759_v47, 0.0  ;;  %v789_v0 = vmax.f32 %v725_v52, 0.0  ;;  %v821_v1 = vmax.f32 %v757_v53, 0.0 }
 0x124   :  { %v726_v58 = vadd.f32 %v1847_v42, %v655_v54  ;;  %v758_v59 = vadd.f32 %v1847_v42, %v687_v55  ;;  %v792_v62 = vmax.f32 %v728_v56, 0.0 }
 0x125   :  { %v824_v63 = vmax.f32 %v760_v57, 0.0  ;;  %v1600_v4 = vpop.f32.mrb[24].mxu0  ;;  %v1632_v5 = vpop.f32.mrb[24].mxu1 }
 0x126   :  { %v790_v2 = vmax.f32 %v726_v58, 0.0  ;;  %v822_v3 = vmax.f32 %v758_v59, 0.0  ;;  %v1385_v6 = vpack.c.bf16 %v792_v62, %v791_v60  ;;  %v660_v8 = vmul.f32 %v1600_v4, %v1842_v40  ;;  %v468_v10 = vpop.f32.mrb[25].mxu0  ;;  %v596_v11 = vpop.f32.mrb[25].mxu1 }
 0x127   :  { %v1465_v7 = vpack.c.bf16 %v824_v63, %v823_v61  ;;  %v692_v9 = vmul.f32 %v1632_v5, %v1842_v40  ;;  %v658_v14 = vmul.f32 %v1842_v40, %v468_v10  ;;  %v690_v15 = vmul.f32 %v1842_v40, %v596_v11  ;;  %v1601_v16 = vpop.f32.mrb[26].mxu0  ;;  %v1633_v17 = vpop.f32.mrb[26].mxu1 }
 0x128   :  { %v1380_v12 = vpack.c.bf16 %v790_v2, %v789_v0  ;;  %v1460_v13 = vpack.c.bf16 %v822_v3, %v821_v1  ;;  %1497 = vst [vmem:[%s2077_s4 + $0x58] sm:$0xff] %v1385_v6   ;;  %v731_v18 = vadd.f32 %v1847_v42, %v660_v8  ;;  %v661_v20 = vmul.f32 %v1601_v16, %v1842_v40  ;;  %v471_v22 = vpop.f32.mrb[27].mxu0  ;;  %v599_v23 = vpop.f32.mrb[27].mxu1 }
 0x129   :  { %1513 = vst [vmem:[%s2077_s4 + $0xd8] sm:$0xff] %v1465_v7   ;;  %v763_v19 = vadd.f32 %v1847_v42, %v692_v9  ;;  %v693_v21 = vmul.f32 %v1633_v17, %v1842_v40  ;;  %v729_v24 = vadd.f32 %v1847_v42, %v658_v14  ;;  %v761_v25 = vadd.f32 %v1847_v42, %v690_v15 }
 0x12a   :  { %1496 = vst [vmem:[%s2077_s4 + $0x50] sm:$0xff] %v1380_v12   ;;  %1512 = vst [vmem:[%s2077_s4 + $0xd0] sm:$0xff] %v1460_v13   ;;  %v659_v26 = vmul.f32 %v1842_v40, %v471_v22  ;;  %v691_v27 = vmul.f32 %v1842_v40, %v599_v23  ;;  %v732_v28 = vadd.f32 %v1847_v42, %v661_v20  ;;  %v795_v32 = vmax.f32 %v731_v18, 0.0 }
 0x12b   :  { %v764_v29 = vadd.f32 %v1847_v42, %v693_v21  ;;  %v827_v33 = vmax.f32 %v763_v19, 0.0  ;;  %v793_v36 = vmax.f32 %v729_v24, 0.0  ;;  %v825_v37 = vmax.f32 %v761_v25, 0.0 }
 0x12c   :  { %v730_v30 = vadd.f32 %v1847_v42, %v659_v26  ;;  %v762_v31 = vadd.f32 %v1847_v42, %v691_v27  ;;  %v796_v34 = vmax.f32 %v732_v28, 0.0 }
 0x12d   :  { %v828_v35 = vmax.f32 %v764_v29, 0.0  ;;  %v1604_v41 = vpop.f32.mrb[28].mxu0  ;;  %v1636_v43 = vpop.f32.mrb[28].mxu1 }
 0x12e   :  { %v794_v38 = vmax.f32 %v730_v30, 0.0  ;;  %v826_v39 = vmax.f32 %v762_v31, 0.0  ;;  %v1395_v44 = vpack.c.bf16 %v796_v34, %v795_v32  ;;  %v664_v46 = vmul.f32 %v1604_v41, %v1842_v40  ;;  %v484_v48 = vpop.f32.mrb[29].mxu0  ;;  %v612_v49 = vpop.f32.mrb[29].mxu1 }
 0x12f   :  { %v1475_v45 = vpack.c.bf16 %v828_v35, %v827_v33  ;;  %v696_v47 = vmul.f32 %v1636_v43, %v1842_v40  ;;  %v662_v52 = vmul.f32 %v1842_v40, %v484_v48  ;;  %v694_v53 = vmul.f32 %v1842_v40, %v612_v49  ;;  %v1605_v54 = vpop.f32.mrb[30].mxu0  ;;  %v1637_v55 = vpop.f32.mrb[30].mxu1 }
 0x130   :  { %v1390_v50 = vpack.c.bf16 %v794_v38, %v793_v36  ;;  %v1470_v51 = vpack.c.bf16 %v826_v39, %v825_v37  ;;  %1499 = vst [vmem:[%s2077_s4 + $0x68] sm:$0xff] %v1395_v44   ;;  %v735_v56 = vadd.f32 %v1847_v42, %v664_v46  ;;  %v665_v58 = vmul.f32 %v1605_v54, %v1842_v40  ;;  %v487_v60 = vpop.f32.mrb[31].mxu0  ;;  %v615_v61 = vpop.f32.mrb[31].mxu1 }
 0x131   :  { %1515 = vst [vmem:[%s2077_s4 + $0xe8] sm:$0xff] %v1475_v45   ;;  %v767_v57 = vadd.f32 %v1847_v42, %v696_v47  ;;  %v697_v59 = vmul.f32 %v1637_v55, %v1842_v40  ;;  %v733_v62 = vadd.f32 %v1847_v42, %v662_v52  ;;  %v765_v63 = vadd.f32 %v1847_v42, %v694_v53 }
 0x132   :  { %1498 = vst [vmem:[%s2077_s4 + $0x60] sm:$0xff] %v1390_v50   ;;  %1514 = vst [vmem:[%s2077_s4 + $0xe0] sm:$0xff] %v1470_v51   ;;  %v663_v0 = vmul.f32 %v1842_v40, %v487_v60  ;;  %v695_v1 = vmul.f32 %v1842_v40, %v615_v61  ;;  %v736_v2 = vadd.f32 %v1847_v42, %v665_v58  ;;  %v799_v6 = vmax.f32 %v735_v56, 0.0 }
 0x133   :  { %v768_v3 = vadd.f32 %v1847_v42, %v697_v59  ;;  %v831_v7 = vmax.f32 %v767_v57, 0.0  ;;  %v797_v10 = vmax.f32 %v733_v62, 0.0  ;;  %v829_v11 = vmax.f32 %v765_v63, 0.0 }
 0x134   :  { %v734_v4 = vadd.f32 %v1847_v42, %v663_v0  ;;  %v766_v5 = vadd.f32 %v1847_v42, %v695_v1  ;;  %v800_v8 = vmax.f32 %v736_v2, 0.0 }
 0x135   :  { %v832_v9 = vmax.f32 %v768_v3, 0.0 }
 0x136   :  { %v798_v12 = vmax.f32 %v734_v4, 0.0  ;;  %v830_v13 = vmax.f32 %v766_v5, 0.0  ;;  %v1405_v14 = vpack.c.bf16 %v800_v8, %v799_v6 }
 0x137   :  { %v1485_v15 = vpack.c.bf16 %v832_v9, %v831_v7 }
 0x138   :  { %v1400_v16 = vpack.c.bf16 %v798_v12, %v797_v10  ;;  %v1480_v40 = vpack.c.bf16 %v830_v13, %v829_v11  ;;  %1501 = vst [vmem:[%s2077_s4 + $0x78] sm:$0xff] %v1405_v14  }
 0x139   :  { %1517 = vst [vmem:[%s2077_s4 + $0xf8] sm:$0xff] %v1485_v15  }
 0x13a   :  { %1500 = vst [vmem:[%s2077_s4 + $0x70] sm:$0xff] %v1400_v16   ;;  %1516 = vst [vmem:[%s2077_s4 + $0xf0] sm:$0xff] %v1480_v40  }

// kernel: _lambda_.5
= control target key start
LH: loop header
LB: loop body
LE: loop exit
PB: predicated region body
PF: predicated region fallthrough
CT: control target
= control target key end

     0   :  { %s1157_s27 = smov 0   ;;  %s1159_s28 = smov 0   ;;  %s1276_s0 = inlined_call_operand.vmem [shape: bf16[2,8,8,128], index: 0, kind: input, shape index: {}]   ;;  %s1277_s1 = inlined_call_operand.vmem [shape: bf16[128,128], index: 1, kind: input, shape index: {}]   ;;  %s1278_s2 = inlined_call_operand.vmem [shape: f32[1,128], index: 2, kind: input, shape index: {}]   ;;  %s1279_s3 = inlined_call_operand.vmem [shape: f32[1,128], index: 3, kind: input, shape index: {}]   ;;  %s1280_s4 = inlined_call_operand.vmem [shape: bf16[2,8,8,128], index: 4, kind: input, shape index: {}]   ;;  %s1281_s5 = inlined_call_operand.vmem [shape: bf16[128,128], index: 5, kind: input, shape index: {}]   ;;  %s1282_s6 = inlined_call_operand.vmem [shape: f32[1,128], index: 6, kind: input, shape index: {}]   ;;  %s1283_s7 = inlined_call_operand.vmem [shape: f32[1,128], index: 7, kind: input, shape index: {}]   ;;  %s1284_s8 = inlined_call_operand.vmem [shape: bf16[2,8,8,128], index: 8, kind: output, shape index: {}]  }
   0x1   :  { %s1161_s29 = smov 0  }
   0x2 LB: > { %s30_s30 = sadd.s32 1, %s1106_s28  ;;  %p905_p0 = scmp.ge.s32.totalorder %s1110_s29, 1  ;;  %s1110_s29 = sphi %s1161_s29, %s18_s29   ;;  %s1106_s28 = sphi %s1159_s28, %s1286_s28   ;;  %s1102_s27 = sphi %s1157_s27, %s1285_s27  }
   0x3   : > { %p32_p1 = scmp.ge.s32.totalorder %s30_s30, 2  ;;  %p300_p2 = scmp.lt.s32.totalorder %s1110_s29, 3 }
   0x5   : > { %s1288_s30 = smov (%p32_p1, %s30_s30), 0  ;;  %p301_p3 = pnand %p905_p0, %p300_p2 }
   0x6   : > { %v1064_v0 = vld [vmem:[%s1277_s1] sm:$0xff] (!%p301_p3)   ;;  %v1066_v2 = vld [vmem:[%s1277_s1 + $0x8] sm:$0xff] (!%p301_p3)   ;;  %p352_p4 = scmp.lt.s32.totalorder (!%p301_p3), %s1102_s27, 1  ;;  %v1068_v4 = vld [vmem:[%s1277_s1 + $0x10] sm:$0xff] (!%p301_p3)  }
   0x7   : > { %304 = sbr.rel (%p301_p3) target bundleno = 275 (0x113), region = 52  ;;  %v1065_v1 = vld [vmem:[%s1281_s5] sm:$0xff] (!%p301_p3)   ;;  %992 = vmatprep.subr.bf16.mxu0 (!%p301_p3), %v1064_v0  ;;  %v1067_v3 = vld [vmem:[%s1281_s5 + $0x8] sm:$0xff] (!%p301_p3)   ;;  %v1069_v5 = vld [vmem:[%s1281_s5 + $0x10] sm:$0xff] (!%p301_p3)  }
   0x8   : > { %1016 = vmatprep.subr.bf16.mxu1 (!%p301_p3), %v1065_v1  ;;  %993 = vmatpush3.bf16.msra.mxu0 (!%p301_p3), %v1064_v0  ;;  %v1070_v6 = vld [vmem:[%s1277_s1 + $0x18] sm:$0xff] (!%p301_p3)   ;;  %v1072_v8 = vld [vmem:[%s1277_s1 + $0x20] sm:$0xff] (!%p301_p3)   ;;  %v1074_v10 = vld [vmem:[%s1277_s1 + $0x28] sm:$0xff] (!%p301_p3)  }
   0x9   : > { %1017 = vmatpush3.bf16.msra.mxu1 (!%p301_p3), %v1065_v1  ;;  %994 = vmatprep.subr.bf16.mxu0 (!%p301_p3), %v1066_v2  ;;  %v1071_v7 = vld [vmem:[%s1281_s5 + $0x18] sm:$0xff] (!%p301_p3)   ;;  %v1073_v9 = vld [vmem:[%s1281_s5 + $0x20] sm:$0xff] (!%p301_p3)   ;;  %v1075_v11 = vld [vmem:[%s1281_s5 + $0x28] sm:$0xff] (!%p301_p3)  }
   0xa   : > { %1018 = vmatprep.subr.bf16.mxu1 (!%p301_p3), %v1067_v3  ;;  %v1076_v14 = vld [vmem:[%s1277_s1 + $0x30] sm:$0xff] (!%p301_p3)   ;;  %v1078_v16 = vld [vmem:[%s1277_s1 + $0x38] sm:$0xff] (!%p301_p3)   ;;  %v924_v24 = vld [vmem:[%s1278_s2] ss:$0 sm:$0xff] (!%p301_p3) }
   0xb   : > { %v1077_v15 = vld [vmem:[%s1281_s5 + $0x30] sm:$0xff] (!%p301_p3)   ;;  %v1079_v17 = vld [vmem:[%s1281_s5 + $0x38] sm:$0xff] (!%p301_p3)   ;;  %v938_v25 = vld [vmem:[%s1282_s6] ss:$0 sm:$0xff] (!%p301_p3) }
   0xc   : > { %995 = vmatpush3.bf16.msra.mxu0 (!%p301_p3), %v1066_v2  ;;  %v925_v27 = vld [vmem:[%s1279_s3] ss:$0 sm:$0xff] (!%p301_p3) }
   0xd   : > { %1019 = vmatpush3.bf16.msra.mxu1 (!%p301_p3), %v1067_v3  ;;  %996 = vmatprep.subr.bf16.mxu0 (!%p301_p3), %v1068_v4  ;;  %v939_v30 = vld [vmem:[%s1283_s7] ss:$0 sm:$0xff] (!%p301_p3) }
   0xe   : > { %s1290_s27 = smov (!%p352_p4, %s1102_s27), 1  ;;  %1020 = vmatprep.subr.bf16.mxu1 %v1069_v5 }
   0xf   : > { %s1199_s25 = sshll.u32 %s1290_s27, 5 }
  0x10   : > { %997 = vmatpush3.bf16.msra.mxu0 %v1068_v4  ;;  %s1211_s14 = scalar_lea.vmem %s1276_s0, %s1199_s25  ;;  %s1220_s18 = scalar_lea.vmem %s1280_s4, %s1199_s25 }
  0x11   : > { %1021 = vmatpush3.bf16.msra.mxu1 %v1069_v5  ;;  %998 = vmatprep.subr.bf16.mxu0 %v1070_v6  ;;  %v1080_v12 = vld [vmem:[%s1211_s14] sm:$0xff]   ;;  %v1082_v18 = vld [vmem:[%s1211_s14 + $0x8] sm:$0xff]   ;;  %v1084_v20 = vld [vmem:[%s1211_s14 + $0x10] sm:$0xff]   ;;  %s1261_s21 = scalar_lea.vmem %s1284_s8, %s1199_s25 }
  0x12   : > { %1022 = vmatprep.subr.bf16.mxu1 %v1071_v7  ;;  %v1081_v13 = vld [vmem:[%s1220_s18] sm:$0xff]   ;;  %1008 = vmatprep.mubr.bf16.mxu0 %v1080_v12  ;;  %v1083_v19 = vld [vmem:[%s1220_s18 + $0x8] sm:$0xff]   ;;  %v1085_v21 = vld [vmem:[%s1220_s18 + $0x10] sm:$0xff]  }
  0x13   : > { %1032 = vmatprep.mubr.bf16.mxu1 %v1081_v13  ;;  %v1086_v22 = vld [vmem:[%s1211_s14 + $0x18] sm:$0xff]  }
  0x14   : > { %999 = vmatpush3.bf16.msra.mxu0 %v1070_v6  ;;  %v1087_v23 = vld [vmem:[%s1220_s18 + $0x18] sm:$0xff]  }
  0x15   : > { %1023 = vmatpush3.bf16.msra.mxu1 %v1071_v7  ;;  %1000 = vmatprep.subr.bf16.mxu0 %v1072_v8 }
  0x16   : > { %1024 = vmatprep.subr.bf16.mxu1 %v1073_v9 }
  0x18   : > { %1001 = vmatpush3.bf16.msra.mxu0 %v1072_v8 }
  0x19   : > { %1025 = vmatpush3.bf16.msra.mxu1 %v1073_v9  ;;  %1002 = vmatprep.subr.bf16.mxu0 %v1074_v10 }
  0x1a   : > { %1026 = vmatprep.subr.bf16.mxu1 %v1075_v11 }
  0x1c   : > { %1003 = vmatpush3.bf16.msra.mxu0 %v1074_v10 }
  0x1d   : > { %1027 = vmatpush3.bf16.msra.mxu1 %v1075_v11  ;;  %1004 = vmatprep.subr.bf16.mxu0 %v1076_v14 }
  0x1e   : > { %1028 = vmatprep.subr.bf16.mxu1 %v1077_v15 }
  0x20   : > { %1005 = vmatpush3.bf16.msra.mxu0 %v1076_v14 }
  0x21   : > { %1029 = vmatpush3.bf16.msra.mxu1 %v1077_v15  ;;  %1006 = vmatprep.subr.bf16.mxu0 %v1078_v16 }
  0x22   : > { %1030 = vmatprep.subr.bf16.mxu1 %v1079_v17 }
  0x24   : > { %1007 = vmatpush3.bf16.msra.mxu0 %v1078_v16 }
  0x25   : > { %1031 = vmatpush3.bf16.msra.mxu1 %v1079_v17 }
  0x27   : > { %1009 = vmatmul.mubr.bf16.vlgmr.msra.gmra.mrb[0].mxu0 %v1082_v18 }
  0x28   : > { %1033 = vmatmul.mubr.bf16.vlgmr.msra.gmra.mrb[0].mxu1 %v1083_v19  ;;  %1012 = vmatprep.mubr.bf16.mxu0 %v1084_v20 }
  0x29   : > { %1036 = vmatprep.mubr.bf16.mxu1 %v1085_v21 }
  0x2f   : > { %1013 = vmatmul.mubr.bf16.gmra.mrb[4].mxu0 %v1086_v22 }
  0x30   : > { %1037 = vmatmul.mubr.bf16.gmra.mrb[4].mxu1 %v1087_v23 }
  0xfa   : > { %v1010_v26 = vpop.f32.mrb[0].mxu0 }
  0xfb   : > { %v552_v28 = vmul.f32 %v1010_v26, %v924_v24  ;;  %v1034_v29 = vpop.f32.mrb[0].mxu1  ;;  %v512_v31 = vpop.f32.mrb[1].mxu0 }
  0xfc   : > { %v743_v32 = vmul.f32 %v1034_v29, %v938_v25  ;;  %v550_v33 = vmul.f32 %v924_v24, %v512_v31  ;;  %v703_v34 = vpop.f32.mrb[1].mxu1  ;;  %v1011_v35 = vpop.f32.mrb[2].mxu0 }
  0xfd   : > { %v567_v36 = vadd.f32 %v925_v27, %v552_v28  ;;  %v741_v37 = vmul.f32 %v938_v25, %v703_v34  ;;  %v553_v38 = vmul.f32 %v1011_v35, %v924_v24  ;;  %v1035_v39 = vpop.f32.mrb[2].mxu1  ;;  %v515_v40 = vpop.f32.mrb[3].mxu0 }
  0xfe   : > { %v758_v41 = vadd.f32 %v939_v30, %v743_v32  ;;  %v565_v42 = vadd.f32 %v925_v27, %v550_v33  ;;  %v744_v43 = vmul.f32 %v1035_v39, %v938_v25  ;;  %v551_v44 = vmul.f32 %v924_v24, %v515_v40  ;;  %v706_v45 = vpop.f32.mrb[3].mxu1 }
  0xff   : > { %v756_v46 = vadd.f32 %v939_v30, %v741_v37  ;;  %v568_v47 = vadd.f32 %v925_v27, %v553_v38  ;;  %v742_v48 = vmul.f32 %v938_v25, %v706_v45 }
 0x100   : > { %v766_v49 = vadd.f32 %v758_v41, %v567_v36  ;;  %v759_v50 = vadd.f32 %v939_v30, %v744_v43  ;;  %v566_v51 = vadd.f32 %v925_v27, %v551_v44 }
 0x101   : > { %v764_v52 = vadd.f32 %v756_v46, %v565_v42  ;;  %v757_v53 = vadd.f32 %v939_v30, %v742_v48 }
 0x102   : > { %v767_v54 = vadd.f32 %v759_v50, %v568_v47  ;;  %v1014_v55 = vpop.f32.mrb[4].mxu0  ;;  %v774_v56 = vmax.f32 %v766_v49, 0.0 }
 0x103   : > { %v765_v57 = vadd.f32 %v757_v53, %v566_v51  ;;  %v556_v58 = vmul.f32 %v1014_v55, %v924_v24  ;;  %v1038_v59 = vpop.f32.mrb[4].mxu1  ;;  %v528_v60 = vpop.f32.mrb[5].mxu0  ;;  %v772_v61 = vmax.f32 %v764_v52, 0.0 }
 0x104   : > { %v775_v62 = vmax.f32 %v767_v54, 0.0  ;;  %v747_v63 = vmul.f32 %v1038_v59, %v938_v25  ;;  %v554_v0 = vmul.f32 %v924_v24, %v528_v60  ;;  %v719_v1 = vpop.f32.mrb[5].mxu1  ;;  %v1015_v2 = vpop.f32.mrb[6].mxu0 }
 0x105   : > { %v773_v3 = vmax.f32 %v765_v57, 0.0  ;;  %v571_v4 = vadd.f32 %v925_v27, %v556_v58  ;;  %v745_v5 = vmul.f32 %v938_v25, %v719_v1  ;;  %v557_v6 = vmul.f32 %v1015_v2, %v924_v24  ;;  %v1039_v7 = vpop.f32.mrb[6].mxu1  ;;  %v531_v8 = vpop.f32.mrb[7].mxu0 }
 0x106   : > { %v953_v9 = vpack.c.bf16 %v775_v62, %v774_v56  ;;  %v762_v10 = vadd.f32 %v939_v30, %v747_v63  ;;  %v569_v11 = vadd.f32 %v925_v27, %v554_v0  ;;  %v748_v12 = vmul.f32 %v1039_v7, %v938_v25  ;;  %v722_v13 = vpop.f32.mrb[7].mxu1 }
 0x107   : > { %v948_v14 = vpack.c.bf16 %v773_v3, %v772_v61  ;;  %v760_v15 = vadd.f32 %v939_v30, %v745_v5  ;;  %v572_v16 = vadd.f32 %v925_v27, %v557_v6  ;;  %v555_v17 = vmul.f32 %v924_v24, %v531_v8 }
 0x108   : > { %965 = vst [vmem:[%s1261_s21 + $0x8] sm:$0xff] %v953_v9   ;;  %v770_v18 = vadd.f32 %v762_v10, %v571_v4  ;;  %v763_v19 = vadd.f32 %v939_v30, %v748_v12  ;;  %v746_v20 = vmul.f32 %v938_v25, %v722_v13 }
 0x109   : > { %949 = vst [vmem:[%s1261_s21] sm:$0xff] %v948_v14   ;;  %v768_v21 = vadd.f32 %v760_v15, %v569_v11  ;;  %v570_v22 = vadd.f32 %v925_v27, %v555_v17 }
 0x10a   : > { %v771_v23 = vadd.f32 %v763_v19, %v572_v16  ;;  %v761_v26 = vadd.f32 %v939_v30, %v746_v20  ;;  %v778_v28 = vmax.f32 %v770_v18, 0.0 }
 0x10b   : > { %v776_v32 = vmax.f32 %v768_v21, 0.0 }
 0x10c   : > { %v779_v29 = vmax.f32 %v771_v23, 0.0  ;;  %v769_v31 = vadd.f32 %v761_v26, %v570_v22 }
 0x10e   : > { %v963_v33 = vpack.c.bf16 %v779_v29, %v778_v28  ;;  %v777_v34 = vmax.f32 %v769_v31, 0.0 }
 0x110   : > { %967 = vst [vmem:[%s1261_s21 + $0x18] sm:$0xff] %v963_v33   ;;  %v958_v35 = vpack.c.bf16 %v777_v34, %v776_v32 }
 0x112   : > { %966 = vst [vmem:[%s1261_s21 + $0x10] sm:$0xff] %v958_v35  }
 0x113 PF: > { %s18_s29 = sadd.s32 1, %s1110_s29   ;;  %s1285_s27 = smov %s1106_s28 }
 0x114   : > { %p15_p5 = scmp.ge.s32.totalorder %s18_s29, 4   ;;  %s1286_s28 = smov %s1288_s30 }
 0x116   :  { %17 = sbr.rel (!%p15_p5) target bundleno = 2 (0x2), region = 85 }

// kernel: _lambda_.4
= control target key start
LH: loop header
LB: loop body
LE: loop exit
PB: predicated region body
PF: predicated region fallthrough
CT: control target
= control target key end

     0   :  { %s3314_s24 = smov 0   ;;  %s3316_s25 = smov 0   ;;  %s3722_s0 = inlined_call_operand.vmem [shape: bf16[2,9,9,128], index: 0, kind: input, shape index: {}]   ;;  %s3723_s1 = inlined_call_operand.vmem [shape: bf16[2,9,9,128], index: 1, kind: input, shape index: {}]   ;;  %s3724_s2 = inlined_call_operand.vmem [shape: bf16[2,9,9,128], index: 2, kind: input, shape index: {}]   ;;  %s3725_s3 = inlined_call_operand.vmem [shape: bf16[2,9,9,128], index: 3, kind: input, shape index: {}]   ;;  %s3726_s4 = inlined_call_operand.vmem [shape: bf16[9,128,128], index: 4, kind: input, shape index: {}]   ;;  %s3727_s5 = inlined_call_operand.vmem [shape: f32[1,128], index: 5, kind: input, shape index: {}]   ;;  %s3728_s6 = inlined_call_operand.vmem [shape: f32[1,128], index: 6, kind: input, shape index: {}]   ;;  %s3729_s7 = inlined_call_operand.vmem [shape: bf16[2,8,8,128], index: 7, kind: output, shape index: {}]  }
   0x1   :  { %s3318_s26 = smov 0  }
   0x2 LB: > { %s29_s27 = sadd.s32 1, %s3268_s25  ;;  %p2422_p0 = scmp.ge.s32.totalorder %s3272_s26, 1  ;;  %s3272_s26 = sphi %s3318_s26, %s17_s26   ;;  %s3268_s25 = sphi %s3316_s25, %s3733_s25   ;;  %s3264_s24 = sphi %s3314_s24, %s3732_s24  }
   0x3   : > { %p31_p1 = scmp.ge.s32.totalorder %s29_s27, 2  ;;  %p281_p2 = scmp.lt.s32.totalorder %s3272_s26, 3 }
   0x5   : > { %s3735_s27 = smov (%p31_p1, %s29_s27), 0  ;;  %p282_p3 = pnand %p2422_p0, %p281_p2 }
   0x6   : > { %v3154_v0 = vld [vmem:[%s3726_s4 + $0x40] sm:$0xff] (!%p282_p3)   ;;  %p332_p4 = scmp.lt.s32.totalorder (!%p282_p3), %s3264_s24, 1  ;;  %v3156_v2 = vld [vmem:[%s3726_s4 + $0x48] sm:$0xff] (!%p282_p3)   ;;  %v3158_v4 = vld [vmem:[%s3726_s4 + $0x50] sm:$0xff] (!%p282_p3)   ;;  %vm708_vm0 = vsmask.f32 (!%p282_p3), 3328 }
   0x7   : > { %285 = sbr.rel (%p282_p3) target bundleno = 394 (0x18a), region = 48  ;;  %v3155_v1 = vld [vmem:[%s3726_s4 + $0x100] sm:$0xff] (!%p282_p3)   ;;  %2833 = vmatprep.subr.bf16.mxu1 (!%p282_p3), %v3154_v0  ;;  %v3157_v3 = vld [vmem:[%s3726_s4 + $0x108] sm:$0xff] (!%p282_p3)   ;;  %v3159_v5 = vld [vmem:[%s3726_s4 + $0x110] sm:$0xff] (!%p282_p3)   ;;  %vm709_vm1 = vsmask.f32 (!%p282_p3), 7440 }
   0x8   : > { %2929 = vmatprep.subr.bf16.mxu0 (!%p282_p3), %v3155_v1  ;;  %2834 = vmatpush3.bf16.msra.mxu1 (!%p282_p3), %v3154_v0  ;;  %v3160_v6 = vld [vmem:[%s3726_s4 + $0x58] sm:$0xff] (!%p282_p3)   ;;  %v3162_v8 = vld [vmem:[%s3726_s4 + $0x60] sm:$0xff] (!%p282_p3)   ;;  %v3164_v10 = vld [vmem:[%s3726_s4 + $0x68] sm:$0xff] (!%p282_p3)  }
   0x9   : > { %2930 = vmatpush3.bf16.msra.mxu0 (!%p282_p3), %v3155_v1  ;;  %2835 = vmatprep.subr.bf16.mxu1 (!%p282_p3), %v3156_v2  ;;  %v3161_v7 = vld [vmem:[%s3726_s4 + $0x118] sm:$0xff] (!%p282_p3)   ;;  %v3163_v9 = vld [vmem:[%s3726_s4 + $0x120] sm:$0xff] (!%p282_p3)   ;;  %v3165_v12 = vld [vmem:[%s3726_s4 + $0x128] sm:$0xff] (!%p282_p3)  }
   0xa   : > { %2931 = vmatprep.subr.bf16.mxu0 (!%p282_p3), %v3157_v3  ;;  %v3166_v14 = vld [vmem:[%s3726_s4 + $0x70] sm:$0xff] (!%p282_p3)   ;;  %v3168_v16 = vld [vmem:[%s3726_s4 + $0x78] sm:$0xff] (!%p282_p3)   ;;  %v3171_v18 = vld [vmem:[%s3726_s4] sm:$0xff] (!%p282_p3)  }
   0xb   : > { %v3167_v15 = vld [vmem:[%s3726_s4 + $0x130] sm:$0xff] (!%p282_p3)   ;;  %v3169_v17 = vld [vmem:[%s3726_s4 + $0x138] sm:$0xff] (!%p282_p3)   ;;  %v3173_v19 = vld [vmem:[%s3726_s4 + $0x140] sm:$0xff] (!%p282_p3)  }
   0xc   : > { %2836 = vmatpush3.bf16.msra.mxu1 (!%p282_p3), %v3156_v2  ;;  %v3176_v22 = vld [vmem:[%s3726_s4 + $0x8] sm:$0xff] (!%p282_p3)   ;;  %v3178_v26 = vld [vmem:[%s3726_s4 + $0x10] sm:$0xff] (!%p282_p3)   ;;  %v3180_v28 = vld [vmem:[%s3726_s4 + $0x18] sm:$0xff] (!%p282_p3)  }
   0xd   : > { %2932 = vmatpush3.bf16.msra.mxu0 (!%p282_p3), %v3157_v3  ;;  %2837 = vmatprep.subr.bf16.mxu1 (!%p282_p3), %v3158_v4  ;;  %v3177_v23 = vld [vmem:[%s3726_s4 + $0x148] sm:$0xff] (!%p282_p3)   ;;  %v3179_v27 = vld [vmem:[%s3726_s4 + $0x150] sm:$0xff] (!%p282_p3)   ;;  %v3181_v31 = vld [vmem:[%s3726_s4 + $0x158] sm:$0xff] (!%p282_p3)  }
   0xe   : > { %s3737_s24 = smov (!%p332_p4, %s3264_s24), 1  ;;  %2933 = vmatprep.subr.bf16.mxu0 %v3159_v5  ;;  %v3182_v38 = vld [vmem:[%s3726_s4 + $0x20] sm:$0xff]   ;;  %v3184_v47 = vld [vmem:[%s3726_s4 + $0x28] sm:$0xff]   ;;  %vm3460_vm2 = vmor %vm708_vm0, %vm709_vm1 }
   0xf   : > { %s3359_s21 = smul.u32 72, %s3737_s24  ;;  %v3183_v43 = vld [vmem:[%s3726_s4 + $0x160] sm:$0xff]   ;;  %v3185_v50 = vld [vmem:[%s3726_s4 + $0x168] sm:$0xff]   ;;  %v3187_v2 = vld [vmem:[%s3726_s4 + $0x30] sm:$0xff]  }
  0x10   : > { %2838 = vmatpush3.bf16.msra.mxu1 %v3158_v4 }
  0x11   : > { %2934 = vmatpush3.bf16.msra.mxu0 %v3159_v5  ;;  %2839 = vmatprep.subr.bf16.mxu1 %v3160_v6  ;;  %s3371_s9 = scalar_lea.vmem %s3723_s1, %s3359_s21  ;;  %s3380_s14 = scalar_lea.vmem %s3725_s3, %s3359_s21 }
  0x12   : > { %2935 = vmatprep.subr.bf16.mxu0 %v3161_v7  ;;  %v3170_v11 = vld [vmem:[%s3371_s9] ss:$8 sps:$4 sm:$0xff]   ;;  %v3174_v20 = vld [vmem:[%s3371_s9 + $0x10] ss:$8 sps:$4 sm:$0xff]   ;;  %s3425_s28 = scalar_lea.vmem %s3722_s0, %s3359_s21  ;;  %s3435_s11 = scalar_lea.vmem %s3724_s2, %s3359_s21 }
  0x13   : > { %2849 = vmatprep.mubr.bf16.mxu1 %v3170_v11  ;;  %v3172_v13 = vld [vmem:[%s3380_s14] ss:$8 sps:$4 sm:$0xff]   ;;  %v3175_v21 = vld [vmem:[%s3380_s14 + $0x10] ss:$8 sps:$4 sm:$0xff]   ;;  %v1322_v34 = vld [vmem:[%s3435_s11 + $0x4] sm:$0x1] }
  0x14   : > { %2840 = vmatpush3.bf16.msra.mxu1 %v3160_v6  ;;  %2945 = vmatprep.mubr.bf16.mxu0 %v3172_v13  ;;  %v3186_v24 = vld [vmem:[%s3371_s9 + $0x20] ss:$8 sps:$4 sm:$0xff]   ;;  %v3190_v29 = vld [vmem:[%s3371_s9 + $0x30] ss:$8 sps:$4 sm:$0xff]   ;;  %v1324_v39 = vld [vmem:[%s3435_s11 + $0xc] sm:$0x1] }
  0x15   : > { %2936 = vmatpush3.bf16.msra.mxu0 %v3161_v7  ;;  %2841 = vmatprep.subr.bf16.mxu1 %v3162_v8  ;;  %v3188_v25 = vld [vmem:[%s3380_s14 + $0x20] ss:$8 sps:$4 sm:$0xff]   ;;  %v3191_v30 = vld [vmem:[%s3380_s14 + $0x30] ss:$8 sps:$4 sm:$0xff]   ;;  %v1347_v40 = vshll.u32 %v1322_v34, 16  ;;  %v1361_v46 = vshll.u32 %v1324_v39, 16 }
  0x16   : > { %2937 = vmatprep.subr.bf16.mxu0 %v3163_v9  ;;  %v3194_v32 = vld [vmem:[%s3425_s28] ss:$8 sps:$4 sm:$0xff]   ;;  %v1325_v56 = vld [vmem:[%s3435_s11 + $0x10] sm:$0xf]  ;;  %v1326_v57 = vld [vmem:[%s3435_s11 + $0x14] sm:$0x1] }
  0x17   : > { %v1321_v33 = vld [vmem:[%s3435_s11] sm:$0xf]  ;;  %v1323_v35 = vld [vmem:[%s3435_s11 + $0x8] sm:$0xf]  ;;  %v1349_v52 = vrot.slane %v1347_v40, 5  ;;  %v1363_v55 = vrot.slane %v1361_v46, 5 }
  0x18   : > { %2842 = vmatpush3.bf16.msra.mxu1 %v3162_v8  ;;  %v1338_v36 = vshrl.u32 %v1321_v33, 16  ;;  %v1341_v37 = vshll.u32 %v1321_v33, 16  ;;  %v1352_v41 = vshrl.u32 %v1323_v35, 16  ;;  %v1355_v42 = vshll.u32 %v1323_v35, 16  ;;  %v1327_v59 = vld [vmem:[%s3435_s11 + $0x18] sm:$0xf] }
  0x19   : > { %2938 = vmatpush3.bf16.msra.mxu0 %v3163_v9  ;;  %2843 = vmatprep.subr.bf16.mxu1 %v3164_v10  ;;  %v1328_v60 = vld [vmem:[%s3435_s11 + $0x1c] sm:$0x1]  ;;  %v1366_v61 = vshrl.u32 %v1325_v56, 16  ;;  %v1369_v63 = vshll.u32 %v1325_v56, 16  ;;  %v1375_v0 = vshll.u32 %v1326_v57, 16  ;;  %v1380_v1 = vshrl.u32 %v1327_v59, 16 }
  0x1a   : > { %2939 = vmatprep.subr.bf16.mxu0 %v3165_v12  ;;  %v1340_v44 = vrot.slane %v1338_v36, 4  ;;  %v1343_v45 = vrot.slane %v1341_v37, 5  ;;  %v1354_v48 = vrot.slane %v1352_v41, 4  ;;  %v1357_v49 = vrot.slane %v1355_v42, 5  ;;  %v3189_v6 = vld [vmem:[%s3726_s4 + $0x170] sm:$0xff]   ;;  %s2701_s14 = sshll.u32 %s3737_s24, 5 }
  0x1b   : > { %v1368_v4 = vrot.slane %v1366_v61, 4  ;;  %v1383_v5 = vshll.u32 %v1327_v59, 16  ;;  %v1371_v8 = vrot.slane %v1369_v63, 5  ;;  %v1382_v9 = vrot.slane %v1380_v1, 4  ;;  %v3208_v37 = vld [vmem:[%s3425_s28 + $0x20] ss:$8 sps:$4 sm:$0xff]   ;;  %s360_s17 = scalar_lea.vmem %s3729_s7, %s2701_s14 }
  0x1c   : > { %2844 = vmatpush3.bf16.msra.mxu1 %v3164_v10  ;;  %v1344_v51 = vor.u32 %v1343_v45, %v1340_v44  ;;  %v1358_v54 = vor.u32 %v1357_v49, %v1354_v48  ;;  %v1389_v10 = vshll.u32 %v1328_v60, 16  ;;  %v3211_v48 = vld [vmem:[%s3425_s28 + $0x30] ss:$8 sps:$4 sm:$0xff]  }
  0x1d   : > { %2940 = vmatpush3.bf16.msra.mxu0 %v3165_v12  ;;  %2845 = vmatprep.subr.bf16.mxu1 %v3166_v14  ;;  %v1377_v12 = vrot.slane %v1375_v0, 5  ;;  %v1385_v13 = vrot.slane %v1383_v5, 5  ;;  %v1333_v49 = vld [vmem:[%s3435_s11 + $0x30] sm:$0xf]  ;;  %v3202_v59 = vld [vmem:[%s3726_s4 + $0x98] sm:$0xff]  }
  0x1e   : > { %2941 = vmatprep.subr.bf16.mxu0 %v3167_v15  ;;  %v1345_v58 = vrot.slane %v1344_v51, 4  ;;  %v1359_v62 = vrot.slane %v1358_v54, 4  ;;  %v1335_v51 = vld [vmem:[%s3435_s11 + $0x38] sm:$0xf]  ;;  %v1422_v56 = vshrl.u32 %v1333_v49, 16  ;;  %v1425_v57 = vshll.u32 %v1333_v49, 16 }
  0x1f   : > { %v1436_v61 = vshrl.u32 %v1335_v51, 16 }
  0x20   : > { %2846 = vmatpush3.bf16.msra.mxu1 %v3166_v14  ;;  %v1350_v3 = vsel %vm3460_vm2, %v1345_v58, %v1349_v52  ;;  %v1364_v7 = vsel %vm3460_vm2, %v1359_v62, %v1363_v55  ;;  %v3192_v14 = vld [vmem:[%s3726_s4 + $0x38] sm:$0xff]   ;;  %v3201_v52 = vld [vmem:[%s3726_s4 + $0x190] sm:$0xff]   ;;  %v1439_v62 = vshll.u32 %v1335_v51, 16  ;;  %v1424_v1 = vrot.slane %v1422_v56, 4 }
  0x21   : > { %2942 = vmatpush3.bf16.msra.mxu0 %v3167_v15  ;;  %2847 = vmatprep.subr.bf16.mxu1 %v3168_v16  ;;  %v2569_v11 = vcombine.low %v1350_v3, %v1364_v7  ;;  %v1372_v15 = vor.u32 %v1371_v8, %v1368_v4  ;;  %v1336_v55 = vld [vmem:[%s3435_s11 + $0x3c] sm:$0x1] }
  0x22   : > { %2943 = vmatprep.subr.bf16.mxu0 %v3169_v17  ;;  %v1445_v63 = vshll.u32 %v1336_v55, 16  ;;  %v3203_v4 = vld [vmem:[%s3726_s4 + $0x198] sm:$0xff]   ;;  %v1441_v7 = vrot.slane %v1439_v62, 5 }
  0x24   : > { %2848 = vmatpush3.bf16.msra.mxu1 %v3168_v16  ;;  %v1386_v16 = vor.u32 %v1385_v13, %v1382_v9  ;;  %v1447_v8 = vrot.slane %v1445_v63, 5  ;;  %v3204_v13 = vld [vmem:[%s3726_s4 + $0xa0] sm:$0xff]  }
  0x25   : > { %2944 = vmatpush3.bf16.msra.mxu0 %v3169_v17  ;;  %2857 = vmatprep.subr.bf16.mxu1 %v3171_v18  ;;  %v1373_v17 = vrot.slane %v1372_v15, 4 }
  0x26   : > { %2953 = vmatprep.subr.bf16.mxu0 %v3173_v19 }
  0x27   : > { %2850 = vmatmul.mubr.bf16.vlgmr.msra.gmra.mrb[0].mxu1 %v3174_v20  ;;  %v1387_v20 = vrot.slane %v1386_v16, 4  ;;  %v694_v16 = vld [vmem:[%s3425_s28 + $0x8] sm:$0xf] }
  0x28   : > { %2858 = vmatpush3.bf16.msra.mxu1 %v3171_v18  ;;  %2946 = vmatmul.mubr.bf16.vlgmr.msra.gmra.mrb[0].mxu0 %v3175_v21  ;;  %v1391_v18 = vrot.slane %v1389_v10, 5  ;;  %v3195_v21 = vld [vmem:[%s3726_s4 + $0x80] sm:$0xff]  }
  0x29   : > { %2954 = vmatpush3.bf16.msra.mxu0 %v3173_v19  ;;  %2859 = vmatprep.subr.bf16.mxu1 %v3176_v22  ;;  %v3193_v19 = vld [vmem:[%s3726_s4 + $0x178] sm:$0xff]  }
  0x2a   : > { %2955 = vmatprep.subr.bf16.mxu0 %v3177_v23  ;;  %2853 = vmatprep.mubr.bf16.mxu1 %v3186_v24  ;;  %v3196_v24 = vld [vmem:[%s3726_s4 + $0x180] sm:$0xff]  }
  0x2b   : > { %2949 = vmatprep.mubr.bf16.mxu0 %v3188_v25  ;;  %v3197_v25 = vld [vmem:[%s3425_s28 + $0x10] ss:$8 sps:$4 sm:$0xff]  }
  0x2c   : > { %2860 = vmatpush3.bf16.msra.mxu1 %v3176_v22  ;;  %v1378_v22 = vsel %vm3460_vm2, %v1373_v17, %v1377_v12  ;;  %v693_v12 = vld [vmem:[%s3425_s28 + $0x4] sm:$0x1]  ;;  %v695_v17 = vld [vmem:[%s3425_s28 + $0xc] sm:$0x1] }
  0x2d   : > { %2956 = vmatpush3.bf16.msra.mxu0 %v3177_v23  ;;  %2861 = vmatprep.subr.bf16.mxu1 %v3178_v26  ;;  %v1392_v23 = vsel %vm3460_vm2, %v1387_v20, %v1391_v18 }
  0x2e   : > { %2957 = vmatprep.subr.bf16.mxu0 %v3179_v27 }
  0x2f   : > { %2854 = vmatmul.mubr.bf16.gmra.mrb[4].mxu1 %v3190_v29  ;;  %v3199_v29 = vld [vmem:[%s3726_s4 + $0x188] sm:$0xff]  }
  0x30   : > { %2862 = vmatpush3.bf16.msra.mxu1 %v3178_v26  ;;  %2950 = vmatmul.mubr.bf16.gmra.mrb[4].mxu0 %v3191_v30  ;;  %v3198_v26 = vld [vmem:[%s3726_s4 + $0x88] sm:$0xff]   ;;  %v1330_v30 = vld [vmem:[%s3435_s11 + $0x24] sm:$0x1] }
  0x31   : > { %2958 = vmatpush3.bf16.msra.mxu0 %v3179_v27  ;;  %2863 = vmatprep.subr.bf16.mxu1 %v3180_v28  ;;  %v1329_v27 = vld [vmem:[%s3435_s11 + $0x20] sm:$0xf]  ;;  %v1403_v35 = vshll.u32 %v1330_v30, 16 }
  0x32   : > { %2959 = vmatprep.subr.bf16.mxu0 %v3181_v31  ;;  %2873 = vmatprep.mubr.bf16.mxu1 %v3194_v32  ;;  %v1332_v32 = vld [vmem:[%s3435_s11 + $0x2c] sm:$0x1]  ;;  %v1394_v33 = vshrl.u32 %v1329_v27, 16  ;;  %v1397_v34 = vshll.u32 %v1329_v27, 16  ;;  %v735_v27 = vshll.u32 %v695_v17, 16 }
  0x33   : > { %2969 = vmatprep.mubr.bf16.mxu0 %v2569_v11  ;;  %v1417_v39 = vshll.u32 %v1332_v32, 16  ;;  %v1405_v44 = vrot.slane %v1403_v35, 5  ;;  %v692_v11 = vld [vmem:[%s3425_s28] sm:$0xf]  ;;  %v3206_v32 = vld [vmem:[%s3726_s4 + $0xa8] sm:$0xff]  }
  0x34   : > { %2864 = vmatpush3.bf16.msra.mxu1 %v3180_v28  ;;  %v2570_v28 = vcombine.low %v1378_v22, %v1392_v23  ;;  %v1396_v40 = vrot.slane %v1394_v33, 4  ;;  %v1399_v41 = vrot.slane %v1397_v34, 5  ;;  %v712_v18 = vshrl.u32 %v692_v11, 16  ;;  %v703_v17 = vld [vmem:[%s3425_s28 + $0x2c] sm:$0x1] }
  0x35   : > { %2960 = vmatpush3.bf16.msra.mxu0 %v3181_v31  ;;  %2865 = vmatprep.subr.bf16.mxu1 %v3182_v38  ;;  %v1331_v31 = vld [vmem:[%s3435_s11 + $0x28] sm:$0xf]  ;;  %v1419_v46 = vrot.slane %v1417_v39, 5  ;;  %v726_v22 = vshrl.u32 %v694_v16, 16  ;;  %v729_v23 = vshll.u32 %v694_v16, 16 }
  0x36   : > { %2961 = vmatprep.subr.bf16.mxu0 %v3183_v43  ;;  %v1408_v36 = vshrl.u32 %v1331_v31, 16  ;;  %v702_v16 = vld [vmem:[%s3425_s28 + $0x28] sm:$0xf] }
  0x37   : > { %v728_v30 = vrot.slane %v726_v22, 4  ;;  %v782_v22 = vshrl.u32 %v702_v16, 16 }
  0x38   : > { %2866 = vmatpush3.bf16.msra.mxu1 %v3182_v38  ;;  %v1411_v38 = vshll.u32 %v1331_v31, 16  ;;  %v1410_v42 = vrot.slane %v1408_v36, 4  ;;  %v731_v31 = vrot.slane %v729_v23, 5  ;;  %v737_v36 = vrot.slane %v735_v27, 5 }
  0x39   : > { %2962 = vmatpush3.bf16.msra.mxu0 %v3183_v43  ;;  %2867 = vmatprep.subr.bf16.mxu1 %v3184_v47  ;;  %v3200_v43 = vld [vmem:[%s3726_s4 + $0x90] sm:$0xff]   ;;  %v785_v23 = vshll.u32 %v702_v16, 16  ;;  %v2654_v16 = vld [vmem:[%s3425_s28 + $0xc] sm:$0x1] }
  0x3a   : > { %2963 = vmatprep.subr.bf16.mxu0 %v3185_v50  ;;  %v1413_v45 = vrot.slane %v1411_v38, 5  ;;  %v3207_v38 = vld [vmem:[%s3726_s4 + $0x1a8] sm:$0xff]  }
  0x3c   : > { %2868 = vmatpush3.bf16.msra.mxu1 %v3184_v47  ;;  %v1400_v47 = vor.u32 %v1399_v41, %v1396_v40  ;;  %v1414_v54 = vor.u32 %v1413_v45, %v1410_v42  ;;  %v732_v40 = vor.u32 %v731_v31, %v728_v30  ;;  %v696_v41 = vld [vmem:[%s3425_s28 + $0x10] sm:$0xf]  ;;  %v787_v31 = vrot.slane %v785_v23, 5 }
  0x3d   : > { %2964 = vmatpush3.bf16.msra.mxu0 %v3185_v50  ;;  %2869 = vmatprep.subr.bf16.mxu1 %v3187_v2  ;;  %v1334_v50 = vld [vmem:[%s3435_s11 + $0x34] sm:$0x1]  ;;  %v740_v45 = vshrl.u32 %v696_v41, 16  ;;  %v704_v30 = vld [vmem:[%s3425_s28 + $0x30] sm:$0xf] }
  0x3e   : > { %2965 = vmatprep.subr.bf16.mxu0 %v3189_v6  ;;  %v1431_v58 = vshll.u32 %v1334_v50, 16  ;;  %v1401_v60 = vrot.slane %v1400_v47, 4  ;;  %v1415_v0 = vrot.slane %v1414_v54, 4  ;;  %v699_v47 = vld [vmem:[%s3425_s28 + $0x1c] sm:$0x1] }
  0x40   : > { %2870 = vmatpush3.bf16.msra.mxu1 %v3187_v2  ;;  %v1427_v2 = vrot.slane %v1425_v57, 5  ;;  %v1433_v3 = vrot.slane %v1431_v58, 5  ;;  %v1406_v5 = vsel %vm3460_vm2, %v1401_v60, %v1405_v44  ;;  %v1420_v9 = vsel %vm3460_vm2, %v1415_v0, %v1419_v46  ;;  %v698_v44 = vld [vmem:[%s3425_s28 + $0x18] sm:$0xf]  ;;  %v3210_v60 = vld [vmem:[%s3726_s4 + $0x1b0] sm:$0xff]  }
  0x41   : > { %2966 = vmatpush3.bf16.msra.mxu0 %v3189_v6  ;;  %2871 = vmatprep.subr.bf16.mxu1 %v3192_v14  ;;  %v1438_v6 = vrot.slane %v1436_v61, 4  ;;  %v733_v46 = vrot.slane %v732_v40, 4  ;;  %v754_v50 = vshrl.u32 %v698_v44, 16  ;;  %v757_v54 = vshll.u32 %v698_v44, 16 }
  0x42   : > { %2967 = vmatprep.subr.bf16.mxu0 %v3193_v19  ;;  %v1428_v10 = vor.u32 %v1427_v2, %v1424_v1  ;;  %v763_v58 = vshll.u32 %v699_v47, 16 }
  0x43   : > { %v1442_v15 = vor.u32 %v1441_v7, %v1438_v6  ;;  %v738_v55 = vsel %vm3460_vm2, %v733_v46, %v737_v36  ;;  %v756_v57 = vrot.slane %v754_v50, 4  ;;  %v759_v63 = vrot.slane %v757_v54, 5  ;;  %v3213_v6 = vld [vmem:[%s3726_s4 + $0x1b8] sm:$0xff]   ;;  %v3214_v7 = vld [vmem:[%s3726_s4 + $0xc0] sm:$0xff]  }
  0x44   : > { %2872 = vmatpush3.bf16.msra.mxu1 %v3192_v14  ;;  %v2571_v14 = vcombine.low %v1406_v5, %v1420_v9  ;;  %v1429_v20 = vrot.slane %v1428_v10, 4  ;;  %v3216_v10 = vld [vmem:[%s3726_s4 + $0x1c0] sm:$0xff]   ;;  %v3222_v50 = vld [vmem:[%s3726_s4 + $0xd8] sm:$0xff]  }
  0x45   : > { %2968 = vmatpush3.bf16.msra.mxu0 %v3193_v19  ;;  %2881 = vmatprep.subr.bf16.mxu1 %v3195_v21  ;;  %v715_v19 = vshll.u32 %v692_v11, 16  ;;  %v760_v1 = vor.u32 %v759_v63, %v756_v57  ;;  %v3217_v11 = vld [vmem:[%s3425_s28 + $0x18] ss:$8 sps:$4 sm:$0xff]  }
  0x46   : > { %2977 = vmatprep.subr.bf16.mxu0 %v3196_v24 }
  0x47   : > { %2874 = vmatmul.mubr.bf16.vlgmr.msra.gmra.mrb[0].mxu1 %v3197_v25  ;;  %v714_v25 = vrot.slane %v712_v18, 4  ;;  %v761_v5 = vrot.slane %v760_v1, 4  ;;  %v3219_v18 = vld [vmem:[%s3726_s4 + $0x1c8] sm:$0xff]   ;;  %v3224_v1 = vld [vmem:[%s3726_s4 + $0xe0] sm:$0xff]  }
  0x48   : > { %2882 = vmatpush3.bf16.msra.mxu1 %v3195_v21  ;;  %2970 = vmatmul.mubr.bf16.vlgmr.msra.gmra.mrb[0].mxu0 %v2570_v28  ;;  %v721_v21 = vshll.u32 %v693_v12, 16  ;;  %v3205_v28 = vld [vmem:[%s3726_s4 + $0x1a0] sm:$0xff]  }
  0x49   : > { %2978 = vmatpush3.bf16.msra.mxu0 %v3196_v24  ;;  %2883 = vmatprep.subr.bf16.mxu1 %v3198_v26  ;;  %v1443_v24 = vrot.slane %v1442_v15, 4  ;;  %v700_v12 = vld [vmem:[%s3425_s28 + $0x20] sm:$0xf]  ;;  %v701_v15 = vld [vmem:[%s3425_s28 + $0x24] sm:$0x1] }
  0x4a   : > { %2979 = vmatprep.subr.bf16.mxu0 %v3199_v29  ;;  %2877 = vmatprep.mubr.bf16.mxu1 %v3208_v37  ;;  %v723_v35 = vrot.slane %v721_v21, 5  ;;  %v3215_v37 = vld [vmem:[%s3425_s28 + $0x8] ss:$8 sps:$4 sm:$0xff]   ;;  %v777_v21 = vshll.u32 %v701_v15, 16 }
  0x4b   : > { %2973 = vmatprep.mubr.bf16.mxu0 %v2571_v14  ;;  %v1448_v33 = vsel %vm3460_vm2, %v1443_v24, %v1447_v8  ;;  %v3218_v14 = vld [vmem:[%s3726_s4 + $0xc8] sm:$0xff]   ;;  %v791_v24 = vshll.u32 %v703_v17, 16  ;;  %v2655_v17 = vld [vmem:[%s3425_s28 + $0x10] sm:$0xf] }
  0x4c   : > { %2884 = vmatpush3.bf16.msra.mxu1 %v3198_v26  ;;  %v717_v26 = vrot.slane %v715_v19, 5  ;;  %v768_v19 = vshrl.u32 %v700_v12, 16  ;;  %v2653_v15 = vld [vmem:[%s3425_s28 + $0x8] sm:$0xf]  ;;  %v1983_v23 = vshll.u32 %v2655_v17, 16 }
  0x4d   : > { %2980 = vmatpush3.bf16.msra.mxu0 %v3199_v29  ;;  %2885 = vmatprep.subr.bf16.mxu1 %v3200_v43  ;;  %v1434_v29 = vsel %vm3460_vm2, %v1429_v20, %v1433_v3  ;;  %v765_v3 = vrot.slane %v763_v58, 5  ;;  %v771_v20 = vshll.u32 %v700_v12, 16  ;;  %v3230_v58 = vld [vmem:[%s3425_s28 + $0x38] ss:$8 sps:$4 sm:$0xff]  }
  0x4e   : > { %2981 = vmatprep.subr.bf16.mxu0 %v3201_v52  ;;  %v718_v34 = vor.u32 %v717_v26, %v714_v25  ;;  %v2572_v39 = vcombine.low %v1434_v29, %v1448_v33  ;;  %v3228_v25 = vld [vmem:[%s3425_s28 + $0x28] ss:$8 sps:$4 sm:$0xff]   ;;  %v770_v26 = vrot.slane %v768_v19, 4  ;;  %v784_v29 = vrot.slane %v782_v22, 4  ;;  %v705_v33 = vld [vmem:[%s3425_s28 + $0x34] sm:$0x1] }
  0x4f   : > { %2878 = vmatmul.mubr.bf16.gmra.mrb[4].mxu1 %v3211_v48  ;;  %v743_v48 = vshll.u32 %v696_v41, 16  ;;  %v766_v9 = vsel %vm3460_vm2, %v761_v5, %v765_v3  ;;  %v773_v27 = vrot.slane %v771_v20, 5  ;;  %v805_v40 = vshll.u32 %v705_v33, 16  ;;  %v3221_v41 = vld [vmem:[%s3726_s4 + $0x1d0] sm:$0xff]   ;;  %v3225_v5 = vld [vmem:[%s3726_s4 + $0x1e0] sm:$0xff]   ;;  %v3232_v12 = vld [vmem:[%s3726_s4 + $0xf8] sm:$0xff]  }
  0x50   : > { %2886 = vmatpush3.bf16.msra.mxu1 %v3200_v43  ;;  %v719_v42 = vrot.slane %v718_v34, 4  ;;  %v697_v43 = vld [vmem:[%s3425_s28 + $0x14] sm:$0x1]  ;;  %2974 = vmatmul.mubr.bf16.gmra.mrb[4].mxu0 %v2572_v39  ;;  %v706_v34 = vld [vmem:[%s3425_s28 + $0x38] sm:$0xf]  ;;  %v799_v39 = vshll.u32 %v704_v30, 16 }
  0x51   : > { %2982 = vmatpush3.bf16.msra.mxu0 %v3201_v52  ;;  %2887 = vmatprep.subr.bf16.mxu1 %v3202_v59  ;;  %v749_v49 = vshll.u32 %v697_v43, 16  ;;  %v742_v52 = vrot.slane %v740_v45, 4  ;;  %v745_v56 = vrot.slane %v743_v48, 5  ;;  %v774_v36 = vor.u32 %v773_v27, %v770_v26  ;;  %v2664_v33 = vld [vmem:[%s3425_s28 + $0x34] sm:$0x1] }
  0x52   : > { %2983 = vmatprep.subr.bf16.mxu0 %v3203_v4  ;;  %v724_v51 = vsel %vm3460_vm2, %v719_v42, %v723_v35  ;;  %2993 = vmatprep.mubr.bf16.mxu0 %v3215_v37  ;;  %v3220_v35 = vld [vmem:[%s3726_s4 + $0xd0] sm:$0xff]   ;;  %v707_v37 = vld [vmem:[%s3425_s28 + $0x3c] sm:$0x1]  ;;  %v788_v42 = vor.u32 %v787_v31, %v784_v29  ;;  %v810_v43 = vshrl.u32 %v706_v34, 16  ;;  %v813_v44 = vshll.u32 %v706_v34, 16 }
  0x53   : > { %v2485_v61 = vcombine.low %v724_v51, %v738_v55  ;;  %v751_v62 = vrot.slane %v749_v49, 5  ;;  %v746_v0 = vor.u32 %v745_v56, %v742_v52  ;;  %v819_v45 = vshll.u32 %v707_v37, 16  ;;  %v2663_v29 = vld [vmem:[%s3425_s28 + $0x30] sm:$0xf]  ;;  %v3237_v34 = vld [vmem:[%s3371_s9 + $0x18] ss:$8 sps:$4 sm:$0xff]  }
  0x54   : > { %2888 = vmatpush3.bf16.msra.mxu1 %v3202_v59  ;;  %v3209_v59 = vld [vmem:[%s3726_s4 + $0xb0] sm:$0xff]   ;;  %v775_v46 = vrot.slane %v774_v36, 4  ;;  %v801_v48 = vrot.slane %v799_v39, 5  ;;  %v807_v49 = vrot.slane %v805_v40, 5  ;;  %v789_v51 = vrot.slane %v788_v42, 4  ;;  %v3239_v39 = vld [vmem:[%s3726_s4 + $0x208] sm:$0xff]  }
  0x55   : > { %2984 = vmatpush3.bf16.msra.mxu0 %v3203_v4  ;;  %2889 = vmatprep.subr.bf16.mxu1 %v3204_v13  ;;  %v747_v2 = vrot.slane %v746_v0, 4  ;;  %v3212_v4 = vld [vmem:[%s3726_s4 + $0xb8] sm:$0xff]   ;;  %v812_v52 = vrot.slane %v810_v43, 4  ;;  %v815_v54 = vrot.slane %v813_v44, 5  ;;  %v821_v55 = vrot.slane %v819_v45, 5 }
  0x56   : > { %2985 = vmatprep.subr.bf16.mxu0 %v3205_v28  ;;  %2897 = vmatprep.mubr.bf16.mxu1 %v2485_v61  ;;  %v3223_v61 = vld [vmem:[%s3726_s4 + $0x1d8] sm:$0xff]   ;;  %v1966_v19 = vshrl.u32 %v2653_v15, 16  ;;  %v1969_v20 = vshll.u32 %v2653_v15, 16  ;;  %v1980_v22 = vshrl.u32 %v2655_v17, 16  ;;  %v2039_v42 = vshll.u32 %v2663_v29, 16  ;;  %v3246_v15 = vld [vmem:[%s3726_s4 + $0x220] sm:$0xff]  }
  0x57   : > { %v752_v8 = vsel %vm3460_vm2, %v747_v2, %v751_v62  ;;  %v2045_v43 = vshll.u32 %v2664_v33, 16  ;;  %v3240_v44 = vld [vmem:[%s3435_s11 + $0x20] ss:$8 sps:$4 sm:$0xff]  }
  0x58   : > { %2890 = vmatpush3.bf16.msra.mxu1 %v3204_v13  ;;  %v2486_v13 = vcombine.low %v752_v8, %v766_v9  ;;  %v3226_v8 = vld [vmem:[%s3726_s4 + $0xe8] sm:$0xff]   ;;  %v1968_v26 = vrot.slane %v1966_v19, 4  ;;  %v1971_v27 = vrot.slane %v1969_v20, 5  ;;  %v1982_v31 = vrot.slane %v1980_v22, 4 }
  0x59   : > { %2986 = vmatpush3.bf16.msra.mxu0 %v3205_v28  ;;  %2891 = vmatprep.subr.bf16.mxu1 %v3206_v32  ;;  %v779_v28 = vrot.slane %v777_v21, 5  ;;  %v3227_v9 = vld [vmem:[%s3726_s4 + $0x1e8] sm:$0xff]   ;;  %v1975_v21 = vshll.u32 %v2654_v16, 16 }
  0x5a   : > { %2987 = vmatprep.subr.bf16.mxu0 %v3207_v38  ;;  %v3247_v20 = vld [vmem:[%s3726_s4 + $0x228] sm:$0xff]  }
  0x5b   : > { %v780_v56 = vsel %vm3460_vm2, %v775_v46, %v779_v28  ;;  %v2662_v28 = vld [vmem:[%s3425_s28 + $0x2c] sm:$0x1]  ;;  %v1977_v45 = vrot.slane %v1975_v21, 5  ;;  %v2666_v21 = vld [vmem:[%s3425_s28 + $0x3c] sm:$0x1] }
  0x5c   : > { %2892 = vmatpush3.bf16.msra.mxu1 %v3206_v32  ;;  %v793_v32 = vrot.slane %v791_v24, 5 }
  0x5d   : > { %2988 = vmatpush3.bf16.msra.mxu0 %v3207_v38  ;;  %2893 = vmatprep.subr.bf16.mxu1 %v3209_v59  ;;  %v796_v38 = vshrl.u32 %v704_v30, 16  ;;  %v3236_v30 = vld [vmem:[%s3435_s11 + $0x10] ss:$8 sps:$4 sm:$0xff]  }
  0x5e   : > { %2989 = vmatprep.subr.bf16.mxu0 %v3210_v60 }
  0x5f   : > { %v798_v47 = vrot.slane %v796_v38, 4  ;;  %v2031_v38 = vshll.u32 %v2662_v28, 16 }
  0x60   : > { %2894 = vmatpush3.bf16.msra.mxu1 %v3209_v59  ;;  %v794_v59 = vsel %vm3460_vm2, %v789_v51, %v793_v32  ;;  %v1985_v32 = vrot.slane %v1983_v23, 5 }
  0x61   : > { %2990 = vmatpush3.bf16.msra.mxu0 %v3210_v60  ;;  %2895 = vmatprep.subr.bf16.mxu1 %v3212_v4  ;;  %v802_v57 = vor.u32 %v801_v48, %v798_v47  ;;  %v816_v60 = vor.u32 %v815_v54, %v812_v52  ;;  %v2487_v62 = vcombine.low %v780_v56, %v794_v59  ;;  %v2041_v54 = vrot.slane %v2039_v42, 5 }
  0x62   : > { %2991 = vmatprep.subr.bf16.mxu0 %v3213_v6  ;;  %v1986_v40 = vor.u32 %v1985_v32, %v1982_v31  ;;  %v2033_v56 = vrot.slane %v2031_v38, 5  ;;  %v2047_v59 = vrot.slane %v2045_v43, 5  ;;  %v2658_v31 = vld [vmem:[%s3425_s28 + $0x1c] sm:$0x1]  ;;  %v2660_v32 = vld [vmem:[%s3425_s28 + $0x24] sm:$0x1] }
  0x63   : > { %v803_v63 = vrot.slane %v802_v57, 4  ;;  %v817_v0 = vrot.slane %v816_v60, 4  ;;  %v3244_v57 = vld [vmem:[%s3726_s4 + $0x210] sm:$0xff]  }
  0x64   : > { %2896 = vmatpush3.bf16.msra.mxu1 %v3212_v4  ;;  %v3235_v4 = vld [vmem:[%s3371_s9 + $0x8] ss:$8 sps:$4 sm:$0xff]   ;;  %v1987_v51 = vrot.slane %v1986_v40, 4 }
  0x65   : > { %2992 = vmatpush3.bf16.msra.mxu0 %v3213_v6  ;;  %2905 = vmatprep.subr.bf16.mxu1 %v3214_v7  ;;  %v808_v2 = vsel %vm3460_vm2, %v803_v63, %v807_v49  ;;  %v822_v3 = vsel %vm3460_vm2, %v817_v0, %v821_v55  ;;  %v3241_v49 = vld [vmem:[%s3371_s9 + $0x28] ss:$8 sps:$4 sm:$0xff]  }
  0x66   : > { %3001 = vmatprep.subr.bf16.mxu0 %v3216_v10  ;;  %v2488_v6 = vcombine.low %v808_v2, %v822_v3  ;;  %v3245_v3 = vld [vmem:[%s3726_s4 + $0x218] sm:$0xff]  }
  0x67   : > { %2898 = vmatmul.mubr.bf16.vlgmr.msra.gmra.mrb[0].mxu1 %v2486_v13  ;;  %v3233_v13 = vld [vmem:[%s3726_s4 + $0x1f8] sm:$0xff]  }
  0x68   : > { %2906 = vmatpush3.bf16.msra.mxu1 %v3214_v7  ;;  %2994 = vmatmul.mubr.bf16.vlgmr.msra.gmra.mrb[0].mxu0 %v3217_v11  ;;  %v3234_v7 = vld [vmem:[%s3435_s11] ss:$8 sps:$4 sm:$0xff]   ;;  %v3231_v11 = vld [vmem:[%s3726_s4 + $0x1f0] sm:$0xff]  }
  0x69   : > { %3002 = vmatpush3.bf16.msra.mxu0 %v3216_v10  ;;  %2907 = vmatprep.subr.bf16.mxu1 %v3218_v14  ;;  %v3229_v10 = vld [vmem:[%s3726_s4 + $0xf0] sm:$0xff]  }
  0x6a   : > { %3003 = vmatprep.subr.bf16.mxu0 %v3219_v18  ;;  %2997 = vmatprep.mubr.bf16.mxu0 %v3228_v25  ;;  %v2661_v25 = vld [vmem:[%s3425_s28 + $0x28] sm:$0xf] }
  0x6b   : > { %2901 = vmatprep.mubr.bf16.mxu1 %v2487_v62  ;;  %v2022_v36 = vshrl.u32 %v2661_v25, 16  ;;  %v2025_v37 = vshll.u32 %v2661_v25, 16 }
  0x6c   : > { %2908 = vmatpush3.bf16.msra.mxu1 %v3218_v14  ;;  %v3238_v14 = vld [vmem:[%s3726_s4 + $0x200] sm:$0xff]  }
  0x6d   : > { %3004 = vmatpush3.bf16.msra.mxu0 %v3219_v18  ;;  %2909 = vmatprep.subr.bf16.mxu1 %v3220_v35  ;;  %v2656_v18 = vld [vmem:[%s3425_s28 + $0x14] sm:$0x1]  ;;  %v2024_v47 = vrot.slane %v2022_v36, 4  ;;  %v2027_v48 = vrot.slane %v2025_v37, 5 }
  0x6e   : > { %3005 = vmatprep.subr.bf16.mxu0 %v3221_v41  ;;  %v1989_v24 = vshll.u32 %v2656_v18, 16  ;;  %v3248_v37 = vld [vmem:[%s3726_s4 + $0x230] sm:$0xff]  }
  0x6f   : > { %2902 = vmatmul.mubr.bf16.gmra.mrb[4].mxu1 %v2488_v6  ;;  %v2028_v55 = vor.u32 %v2027_v48, %v2024_v47  ;;  %v2667_v6 = vld [vmem:[%s3425_s28 + $0x40] sm:$0xf] }
  0x70   : > { %2910 = vmatpush3.bf16.msra.mxu1 %v3220_v35  ;;  %2998 = vmatmul.mubr.bf16.gmra.mrb[4].mxu0 %v3230_v58  ;;  %v1972_v35 = vor.u32 %v1971_v27, %v1968_v26  ;;  %v1991_v46 = vrot.slane %v1989_v24, 5 }
  0x71   : > { %3006 = vmatpush3.bf16.msra.mxu0 %v3221_v41  ;;  %2911 = vmatprep.subr.bf16.mxu1 %v3222_v50  ;;  %v2036_v41 = vshrl.u32 %v2663_v29, 16  ;;  %v2029_v60 = vrot.slane %v2028_v55, 4 }
  0x72   : > { %3007 = vmatprep.subr.bf16.mxu0 %v3223_v61  ;;  %3017 = vmatprep.mubr.bf16.mxu0 %v3235_v4  ;;  %v1992_v63 = vsel %vm3460_vm2, %v1987_v51, %v1991_v46  ;;  %v3249_v46 = vld [vmem:[%s3726_s4 + $0x238] sm:$0xff]  }
  0x73   : > { %2921 = vmatprep.mubr.bf16.mxu1 %v3234_v7  ;;  %v2038_v52 = vrot.slane %v2036_v41, 4  ;;  %v2034_v2 = vsel %vm3460_vm2, %v2029_v60, %v2033_v56  ;;  %v2017_v41 = vshll.u32 %v2660_v32, 16 }
  0x74   : > { %2912 = vmatpush3.bf16.msra.mxu1 %v3222_v50  ;;  %v1973_v50 = vrot.slane %v1972_v35, 4 }
  0x75   : > { %3008 = vmatpush3.bf16.msra.mxu0 %v3223_v61  ;;  %2913 = vmatprep.subr.bf16.mxu1 %v3224_v1  ;;  %v2042_v58 = vor.u32 %v2041_v54, %v2038_v52  ;;  %v3242_v61 = vld [vmem:[%s3435_s11 + $0x30] ss:$8 sps:$4 sm:$0xff]  }
  0x76   : > { %3009 = vmatprep.subr.bf16.mxu0 %v3225_v5  ;;  %v1978_v62 = vsel %vm3460_vm2, %v1973_v50, %v1977_v45  ;;  %v2019_v50 = vrot.slane %v2017_v41, 5 }
  0x77   : > { %v2043_v0 = vrot.slane %v2042_v58, 4  ;;  %v2685_v7 = vcombine.low %v1978_v62, %v1992_v63 }
  0x78   : > { %2914 = vmatpush3.bf16.msra.mxu1 %v3224_v1  ;;  %v3243_v1 = vld [vmem:[%s3371_s9 + $0x38] ss:$8 sps:$4 sm:$0xff]  }
  0x79   : > { %3010 = vmatpush3.bf16.msra.mxu0 %v3225_v5  ;;  %2915 = vmatprep.subr.bf16.mxu1 %v3226_v8  ;;  %v2048_v4 = vsel %vm3460_vm2, %v2043_v0, %v2047_v59  ;;  %v2665_v5 = vld [vmem:[%s3425_s28 + $0x38] sm:$0xf] }
  0x7a   : > { %3011 = vmatprep.subr.bf16.mxu0 %v3227_v9 }
  0x7c   : > { %2916 = vmatpush3.bf16.msra.mxu1 %v3226_v8  ;;  %v2657_v8 = vld [vmem:[%s3425_s28 + $0x18] sm:$0xf] }
  0x7d   : > { %3012 = vmatpush3.bf16.msra.mxu0 %v3227_v9  ;;  %2917 = vmatprep.subr.bf16.mxu1 %v3229_v10  ;;  %v2659_v9 = vld [vmem:[%s3425_s28 + $0x20] sm:$0xf]  ;;  %v1994_v16 = vshrl.u32 %v2657_v8, 16  ;;  %v1997_v17 = vshll.u32 %v2657_v8, 16 }
  0x7e   : > { %3013 = vmatprep.subr.bf16.mxu0 %v3231_v11  ;;  %v2008_v18 = vshrl.u32 %v2659_v9, 16  ;;  %v2011_v19 = vshll.u32 %v2659_v9, 16  ;;  %v2697_v9 = vld [vmem:[%s3727_s5] ss:$0 sm:$0xff] }
  0x7f   : > { %v1996_v26 = vrot.slane %v1994_v16, 4  ;;  %v1999_v27 = vrot.slane %v1997_v17, 5 }
  0x80   : > { %2918 = vmatpush3.bf16.msra.mxu1 %v3229_v10  ;;  %v2687_v10 = vcombine.low %v2034_v2, %v2048_v4  ;;  %v2010_v28 = vrot.slane %v2008_v18, 4  ;;  %v2013_v29 = vrot.slane %v2011_v19, 5 }
  0x81   : > { %3014 = vmatpush3.bf16.msra.mxu0 %v3231_v11  ;;  %2919 = vmatprep.subr.bf16.mxu1 %v3232_v12  ;;  %v2050_v11 = vshrl.u32 %v2665_v5, 16  ;;  %v2000_v38 = vor.u32 %v1999_v27, %v1996_v26 }
  0x82   : > { %3015 = vmatprep.subr.bf16.mxu0 %v3233_v13  ;;  %v2014_v40 = vor.u32 %v2013_v29, %v2010_v28 }
  0x83   : > { %v2052_v22 = vrot.slane %v2050_v11, 4  ;;  %v2001_v47 = vrot.slane %v2000_v38, 4 }
  0x84   : > { %2920 = vmatpush3.bf16.msra.mxu1 %v3232_v12  ;;  %v2053_v12 = vshll.u32 %v2665_v5, 16 }
  0x85   : > { %3016 = vmatpush3.bf16.msra.mxu0 %v3233_v13  ;;  %3049 = vmatprep.subr.bf16.mxu1 %v3238_v14  ;;  %v2064_v13 = vshrl.u32 %v2667_v6, 16 }
  0x86   : > { %3025 = vmatprep.subr.bf16.mxu0 %v3238_v14  ;;  %v2055_v23 = vrot.slane %v2053_v12, 5 }
  0x87   : > { %2922 = vmatmul.mubr.bf16.vlgmr.msra.gmra.mrb[0].mxu1 %v3236_v30  ;;  %v2066_v24 = vrot.slane %v2064_v13, 4  ;;  %v2668_v30 = vld [vmem:[%s3425_s28 + $0x44] sm:$0x1] }
  0x88   : > { %3018 = vmatmul.mubr.bf16.vlgmr.msra.gmra.mrb[0].mxu0 %v3237_v34  ;;  %3057 = vmatpush3.bf16.msra.mxu1 %v3238_v14  ;;  %v2056_v33 = vor.u32 %v2055_v23, %v2052_v22  ;;  %v2059_v34 = vshll.u32 %v2666_v21, 16  ;;  %v2073_v36 = vshll.u32 %v2668_v30, 16 }
  0x89   : > { %3026 = vmatpush3.bf16.msra.mxu0 %v3238_v14  ;;  %3050 = vmatprep.subr.bf16.mxu1 %v3239_v39  ;;  %v2067_v14 = vshll.u32 %v2667_v6, 16 }
  0x8a   : > { %3027 = vmatprep.subr.bf16.mxu0 %v3239_v39  ;;  %2925 = vmatprep.mubr.bf16.mxu1 %v3240_v44  ;;  %v2057_v42 = vrot.slane %v2056_v33, 4  ;;  %v2061_v43 = vrot.slane %v2059_v34, 5  ;;  %v2075_v45 = vrot.slane %v2073_v36, 5 }
  0x8b   : > { %3021 = vmatprep.mubr.bf16.mxu0 %v3241_v49  ;;  %v2069_v25 = vrot.slane %v2067_v14, 5  ;;  %v2015_v49 = vrot.slane %v2014_v40, 4 }
  0x8c   : > { %3058 = vmatpush3.bf16.msra.mxu1 %v3239_v39  ;;  %v2062_v51 = vsel %vm3460_vm2, %v2057_v42, %v2061_v43 }
  0x8d   : > { %3028 = vmatpush3.bf16.msra.mxu0 %v3239_v39  ;;  %3051 = vmatprep.subr.bf16.mxu1 %v3244_v57  ;;  %v2070_v35 = vor.u32 %v2069_v25, %v2066_v24  ;;  %v2003_v39 = vshll.u32 %v2658_v31, 16  ;;  %v2020_v55 = vsel %vm3460_vm2, %v2015_v49, %v2019_v50 }
  0x8e   : > { %3029 = vmatprep.subr.bf16.mxu0 %v3244_v57 }
  0x8f   : > { %2926 = vmatmul.mubr.bf16.gmra.mrb[4].mxu1 %v3242_v61  ;;  %v2071_v44 = vrot.slane %v2070_v35, 4  ;;  %v2005_v48 = vrot.slane %v2003_v39, 5 }
  0x90   : > { %3022 = vmatmul.mubr.bf16.gmra.mrb[4].mxu0 %v3243_v1  ;;  %3059 = vmatpush3.bf16.msra.mxu1 %v3244_v57 }
  0x91   : > { %3030 = vmatpush3.bf16.msra.mxu0 %v3244_v57  ;;  %3052 = vmatprep.subr.bf16.mxu1 %v3245_v3  ;;  %v2076_v52 = vsel %vm3460_vm2, %v2071_v44, %v2075_v45  ;;  %v2006_v54 = vsel %vm3460_vm2, %v2001_v47, %v2005_v48 }
  0x92   : > { %3031 = vmatprep.subr.bf16.mxu0 %v3245_v3  ;;  %3041 = vmatprep.mubr.bf16.mxu0 %v2685_v7  ;;  %v2688_v56 = vcombine.low %v2062_v51, %v2076_v52  ;;  %v2686_v57 = vcombine.low %v2006_v54, %v2020_v55 }
  0x93   : > { %3045 = vmatprep.mubr.bf16.mxu1 %v2687_v10 }
  0x94   : > { %3060 = vmatpush3.bf16.msra.mxu1 %v3245_v3 }
  0x95   : > { %3032 = vmatpush3.bf16.msra.mxu0 %v3245_v3  ;;  %3053 = vmatprep.subr.bf16.mxu1 %v3246_v15 }
  0x96   : > { %3033 = vmatprep.subr.bf16.mxu0 %v3246_v15 }
  0x98   : > { %3061 = vmatpush3.bf16.msra.mxu1 %v3246_v15 }
  0x99   : > { %3034 = vmatpush3.bf16.msra.mxu0 %v3246_v15  ;;  %3054 = vmatprep.subr.bf16.mxu1 %v3247_v20  ;;  %v2698_v15 = vld [vmem:[%s3728_s6] ss:$0 sm:$0xff] }
  0x9a   : > { %3035 = vmatprep.subr.bf16.mxu0 %v3247_v20 }
  0x9c   : > { %3062 = vmatpush3.bf16.msra.mxu1 %v3247_v20 }
  0x9d   : > { %3036 = vmatpush3.bf16.msra.mxu0 %v3247_v20  ;;  %3055 = vmatprep.subr.bf16.mxu1 %v3248_v37 }
  0x9e   : > { %3037 = vmatprep.subr.bf16.mxu0 %v3248_v37 }
  0xa0   : > { %3063 = vmatpush3.bf16.msra.mxu1 %v3248_v37 }
  0xa1   : > { %3038 = vmatpush3.bf16.msra.mxu0 %v3248_v37  ;;  %3056 = vmatprep.subr.bf16.mxu1 %v3249_v46 }
  0xa2   : > { %3039 = vmatprep.subr.bf16.mxu0 %v3249_v46 }
  0xa4   : > { %3064 = vmatpush3.bf16.msra.mxu1 %v3249_v46 }
  0xa5   : > { %3040 = vmatpush3.bf16.msra.mxu0 %v3249_v46 }
  0xa7   : > { %3046 = vmatmul.mubr.bf16.vlgmr.msra.gmra.mrb[8].mxu1 %v2688_v56 }
  0xa8   : > { %3042 = vmatmul.mubr.bf16.vlgmr.msra.gmra.mrb[0].mxu0 %v2686_v57 }
 0x15a   : > { %v2923_v58 = vpop.f32.mrb[0].mxu1 }
 0x15b   : > { %v1110_v59 = vpop.f32.mrb[1].mxu1 }
 0x15c   : > { %v2924_v60 = vpop.f32.mrb[2].mxu1 }
 0x15d   : > { %v1113_v61 = vpop.f32.mrb[3].mxu1 }
 0x162   : > { %v2927_v62 = vpop.f32.mrb[4].mxu1 }
 0x163   : > { %v3023_v63 = vpop.f32.mrb[4].mxu0  ;;  %v1126_v0 = vpop.f32.mrb[5].mxu1 }
 0x164   : > { %v3069_v1 = vadd.f32 %v3023_v63, %v2927_v62  ;;  %v1926_v2 = vpop.f32.mrb[5].mxu0  ;;  %v2928_v3 = vpop.f32.mrb[6].mxu1 }
 0x165   : > { %v3071_v4 = vadd.f32 %v1926_v2, %v1126_v0  ;;  %v3024_v53 = vpop.f32.mrb[6].mxu0  ;;  %v1129_v5 = vpop.f32.mrb[7].mxu1 }
 0x166   : > { %v3073_v6 = vadd.f32 %v3024_v53, %v2928_v3  ;;  %v1929_v7 = vpop.f32.mrb[7].mxu0 }
 0x167   : > { %v3075_v8 = vadd.f32 %v1929_v7, %v1129_v5 }
 0x17a   : > { %v3047_v10 = vpop.f32.mrb[8].mxu1 }
 0x17b   : > { %v3043_v11 = vpop.f32.mrb[0].mxu0  ;;  %v3070_v12 = vadd.f32 %v3069_v1, %v3047_v10  ;;  %v2208_v13 = vpop.f32.mrb[9].mxu1 }
 0x17c   : > { %v3065_v14 = vadd.f32 %v3043_v11, %v2923_v58  ;;  %v2192_v16 = vpop.f32.mrb[1].mxu0  ;;  %v3072_v17 = vadd.f32 %v3071_v4, %v2208_v13  ;;  %v3048_v18 = vpop.f32.mrb[10].mxu1 }
 0x17d   : > { %v2244_v19 = vmul.f32 %v3070_v12, %v2697_v9  ;;  %v3066_v20 = vadd.f32 %v2192_v16, %v1110_v59  ;;  %v3044_v21 = vpop.f32.mrb[2].mxu0  ;;  %v3074_v22 = vadd.f32 %v3073_v6, %v3048_v18  ;;  %v2211_v23 = vpop.f32.mrb[11].mxu1 }
 0x17e   : > { %v2240_v24 = vmul.f32 %v3065_v14, %v2697_v9  ;;  %v2242_v25 = vmul.f32 %v3072_v17, %v2697_v9  ;;  %v3067_v26 = vadd.f32 %v3044_v21, %v2924_v60  ;;  %v2195_v27 = vpop.f32.mrb[3].mxu0  ;;  %v3076_v28 = vadd.f32 %v3075_v8, %v2211_v23 }
 0x17f   : > { %v2259_v29 = vadd.f32 %v2698_v15, %v2244_v19  ;;  %v2238_v30 = vmul.f32 %v3066_v20, %v2697_v9  ;;  %v2245_v31 = vmul.f32 %v3074_v22, %v2697_v9  ;;  %v3068_v32 = vadd.f32 %v2195_v27, %v1113_v61 }
 0x180   : > { %v2255_v33 = vadd.f32 %v2698_v15, %v2240_v24  ;;  %v2257_v34 = vadd.f32 %v2698_v15, %v2242_v25  ;;  %v2241_v35 = vmul.f32 %v3067_v26, %v2697_v9  ;;  %v2243_v36 = vmul.f32 %v3076_v28, %v2697_v9 }
 0x181   : > { %v2253_v37 = vadd.f32 %v2698_v15, %v2238_v30  ;;  %v2260_v38 = vadd.f32 %v2698_v15, %v2245_v31  ;;  %v2239_v39 = vmul.f32 %v3068_v32, %v2697_v9  ;;  %v2267_v42 = vmax.f32 %v2259_v29, 0.0 }
 0x182   : > { %v2256_v40 = vadd.f32 %v2698_v15, %v2241_v35  ;;  %v2258_v41 = vadd.f32 %v2698_v15, %v2243_v36  ;;  %v2263_v45 = vmax.f32 %v2255_v33, 0.0  ;;  %v2265_v46 = vmax.f32 %v2257_v34, 0.0 }
 0x183   : > { %v2268_v43 = vmax.f32 %v2260_v38, 0.0  ;;  %v2254_v44 = vadd.f32 %v2698_v15, %v2239_v39  ;;  %v2261_v49 = vmax.f32 %v2253_v37, 0.0 }
 0x184   : > { %v2264_v47 = vmax.f32 %v2256_v40, 0.0  ;;  %v2266_v48 = vmax.f32 %v2258_v41, 0.0 }
 0x185   : > { %v2720_v50 = vpack.c.bf16 %v2268_v43, %v2267_v42  ;;  %v2262_v51 = vmax.f32 %v2254_v44, 0.0 }
 0x186   : > { %v2710_v52 = vpack.c.bf16 %v2264_v47, %v2263_v45  ;;  %v2715_v54 = vpack.c.bf16 %v2266_v48, %v2265_v46 }
 0x187   : > { %2724 = vst [vmem:[%s360_s17 + $0x18] sm:$0xff] %v2720_v50   ;;  %v2705_v55 = vpack.c.bf16 %v2262_v51, %v2261_v49 }
 0x188   : > { %2722 = vst [vmem:[%s360_s17 + $0x8] sm:$0xff] %v2710_v52   ;;  %2723 = vst [vmem:[%s360_s17 + $0x10] sm:$0xff] %v2715_v54  }
 0x189   : > { %2706 = vst [vmem:[%s360_s17] sm:$0xff] %v2705_v55  }
 0x18a PF: > { %s17_s26 = sadd.s32 1, %s3272_s26   ;;  %s3732_s24 = smov %s3268_s25 }
 0x18b   : > { %p14_p5 = scmp.ge.s32.totalorder %s17_s26, 4   ;;  %s3733_s25 = smov %s3735_s27 }
 0x18d   :  { %16 = sbr.rel (!%p14_p5) target bundleno = 2 (0x2), region = 101 }

</bundles_post_ra>
